<compile_context>
chip_gen: v7x
topology: tpu7x:2x2x1
jax: 0.10.0
libtpu: 0.0.40
codegen_flags: <defaults>
</compile_context>

<pallas_src>
import functools

import jax
import jax.numpy as jnp
from jax.experimental import pallas as pl
from jax.experimental.pallas import tpu as pltpu


def _round_up(x, m):
    return ((x + m - 1) // m) * m


def _mlp_kernel(x_ref, w1_ref, b1_ref, w2_ref, b2_ref, o_ref):
    # x_ref:  (TB, D)   f32 activations (cast to bf16 here, on the VPU)
    # w1_ref: (D, Hp)   bf16 (pre-transposed, hidden padded to Hp)
    # b1_ref: (1, Hp)   f32
    # w2_ref: (Hp, Cp)  bf16 (pre-transposed, classes padded to Cp)
    # b2_ref: (1, Cp)   f32
    # o_ref:  (TB, Cp)  bf16
    x = x_ref[...].astype(w1_ref.dtype)                       # in-kernel cast (hidden under MXU)
    h = jnp.dot(x, w1_ref[...], preferred_element_type=jnp.float32)
    h = jnp.maximum(h + b1_ref[...], 0.0)                     # fused bias + ReLU in f32
    y = jnp.dot(h.astype(w2_ref.dtype), w2_ref[...],
                preferred_element_type=jnp.float32)
    o_ref[...] = (y + b2_ref[...]).astype(o_ref.dtype)


def prepare_mlp_params(w1, b1, w2, b2, compute_dtype=jnp.bfloat16):
    """One-time glue: transpose to (in, out), zero-pad to lane-dense widths, cast.

    Inputs follow the PyTorch nn.Linear convention:
      w1: (hidden, in_features), b1: (hidden,), w2: (n_category, hidden), b2: (n_category,)
    Returns a dict of ARRAYS ONLY (safe to pass through jit).
    """
    in_features = int(w1.shape[1])
    hidden = int(w1.shape[0])
    n_category = int(w2.shape[0])
    hp = _round_up(hidden, 128)       # 1000 -> 1024
    cp = _round_up(n_category, 128)   # 10   -> 128  (do NOT pad further — see review)

    w1_t = jnp.zeros((in_features, hp), compute_dtype)
    w1_t = w1_t.at[:, :hidden].set(w1.T.astype(compute_dtype))
    b1_p = jnp.zeros((1, hp), jnp.float32).at[:, :hidden].set(b1.astype(jnp.float32))

    w2_t = jnp.zeros((hp, cp), compute_dtype)
    w2_t = w2_t.at[:hidden, :n_category].set(w2.T.astype(compute_dtype))
    b2_p = jnp.zeros((1, cp), jnp.float32).at[:, :n_category].set(b2.astype(jnp.float32))

    return dict(w1=w1_t, b1=b1_p, w2=w2_t, b2=b2_p)


@functools.partial(jax.jit, static_argnames=("n_category", "tile_b"))
def mlp_forward(x, params, *, n_category, tile_b=2048):
    """Forward pass of the MLP. Returns (B, n_category) float32.

    tile_b: max batch rows per grid step. 2048 is a safe default on all generations
    (v7x's 64 MiB VMEM included); raise to 4096-8192 on v5e/v6e for peak throughput.
    """
    w1, b1, w2, b2 = params["w1"], params["b1"], params["w2"], params["b2"]
    in_features = w1.shape[0]          # static (derived from array shape)
    hp = w1.shape[1]
    cp = w2.shape[1]

    # x.reshape(len(x), -1); keep native f32 — the bf16 cast happens inside the kernel.
    x2d = x.reshape(x.shape[0], -1)
    assert x2d.shape[1] == in_features, (x2d.shape, in_features)
    x2d = x2d.astype(jnp.float32)
    batch = x2d.shape[0]

    # Tile the batch. Guarantee >=2 grid steps for large batches so the "parallel"
    # axis can be split across v7x's two TensorCores; small batches use one full tile.
    if batch <= tile_b:
        tb = _round_up(pl.cdiv(batch, 2), 8) if batch > 512 else batch
    else:
        tb = tile_b
    grid = (pl.cdiv(batch, tb),)

    # Derive the VMEM limit from the actual working set (double-buffered x/out,
    # resident weights, f32 hidden temp) with headroom, instead of hardcoding.
    in_p = _round_up(in_features, 128)
    w_dt = jnp.dtype(w1.dtype).itemsize
    working = (2 * tb * in_p * 4              # x tiles, f32, double-buffered
               + 2 * tb * cp * 2              # out tiles, bf16, double-buffered
               + 2 * (in_features * hp + hp * cp) * w_dt   # weights (2 bufs worst case)
               + 2 * (hp + cp) * 4            # biases
               + tb * hp * 4)                 # f32 hidden activation temp
    vmem_limit = min(max(int(working * 1.3) + (4 << 20), 32 << 20), 100 << 20)

    cost = pl.CostEstimate(
        flops=2 * batch * (in_features * hp + hp * cp),
        transcendentals=0,
        bytes_accessed=(batch * in_features * 4         # f32 activations in
                        + in_features * hp * w_dt       # w1
                        + hp * cp * w_dt                # w2
                        + batch * cp * 2),              # bf16 logits out
    )

    out_padded = pl.pallas_call(
        _mlp_kernel,
        out_shape=jax.ShapeDtypeStruct((batch, cp), jnp.bfloat16),
        grid_spec=pltpu.PrefetchScalarGridSpec(
            num_scalar_prefetch=0,
            grid=grid,
            in_specs=[
                pl.BlockSpec((tb, in_features), lambda i: (i, 0)),   # x: tiled over batch
                pl.BlockSpec((in_features, hp), lambda i: (0, 0)),   # w1: VMEM-resident
                pl.BlockSpec((1, hp), lambda i: (0, 0)),             # b1
                pl.BlockSpec((hp, cp), lambda i: (0, 0)),            # w2: VMEM-resident
                pl.BlockSpec((1, cp), lambda i: (0, 0)),             # b2
            ],
            out_specs=pl.BlockSpec((tb, cp), lambda i: (i, 0)),      # lane-dense (cp=128)
        ),
        compiler_params=pltpu.CompilerParams(
            dimension_semantics=("parallel",),          # independent batch tiles
            vmem_limit_bytes=vmem_limit,
        ),
        cost_estimate=cost,
    )(x2d, w1, b1, w2, b2)

    # Slice the zero-padded class columns off and hand back f32 logits (fuses in-jit).
    # TODO(synk): if the consumer is a softmax/argmax kernel, consume the padded
    # (B, 128) bf16 tensor directly (with -inf bias padding) and skip this slice.
    return out_padded[:, :n_category].astype(jnp.float32)


def _reference(x, w1, b1, w2, b2, compute_dtype=jnp.bfloat16):
    """Plain-JAX reference that mimics the kernel's casts."""
    x2d = x.reshape(x.shape[0], -1).astype(compute_dtype).astype(jnp.float32)
    w1c = w1.astype(compute_dtype).astype(jnp.float32)
    w2c = w2.astype(compute_dtype).astype(jnp.float32)
    h = jnp.maximum(x2d @ w1c.T + b1.astype(jnp.float32), 0.0)
    h = h.astype(compute_dtype).astype(jnp.float32)
    y = h @ w2c.T + b2.astype(jnp.float32)
    return y.astype(compute_dtype).astype(jnp.float32)


if __name__ == "__main__":
    in_features = 28 * 28     # 784
    hidden = 1000
    n_category = 10
    batch = 8

    key = jax.random.PRNGKey(0)
    kx, kw1, kb1, kw2, kb2 = jax.random.split(key, 5)

    # nn.Linear-style init: U(-1/sqrt(fan_in), 1/sqrt(fan_in))
    bound1 = 1.0 / jnp.sqrt(jnp.float32(in_features))
    w1 = jax.random.uniform(kw1, (hidden, in_features), minval=-bound1, maxval=bound1,
                            dtype=jnp.float32)
    b1 = jax.random.uniform(kb1, (hidden,), minval=-bound1, maxval=bound1,
                            dtype=jnp.float32)
    bound2 = 1.0 / jnp.sqrt(jnp.float32(hidden))
    w2 = jax.random.uniform(kw2, (n_category, hidden), minval=-bound2, maxval=bound2,
                            dtype=jnp.float32)
    b2 = jax.random.uniform(kb2, (n_category,), minval=-bound2, maxval=bound2,
                            dtype=jnp.float32)

    # MNIST-like NCHW input; forward flattens to (batch, 784).
    x = jax.random.normal(kx, (batch, 1, 28, 28), dtype=jnp.float32)

    # Prepare (transpose / pad / cast) once, outside the per-step forward.
    params = prepare_mlp_params(w1, b1, w2, b2, compute_dtype=jnp.bfloat16)

    out = mlp_forward(x, params, n_category=n_category)
    out = jax.block_until_ready(out)

    ref = _reference(x, w1, b1, w2, b2, jnp.bfloat16)
    assert out.shape == (batch, n_category), out.shape
    max_err = float(jnp.max(jnp.abs(out - ref)))
    assert jnp.allclose(out, ref, atol=2e-2, rtol=2e-2), max_err

    print("KERNEL_OK")
</pallas_src>

<mosaic_0001>
module attributes {stable_mosaic.version = 11 : i64} {
  func.func @_mlp_kernel(%arg0: i32, %arg1: memref<8x784xf32, #tpu.memory_space<vmem>>, %arg2: memref<784x1024xbf16, #tpu.memory_space<vmem>>, %arg3: memref<1x1024xf32, #tpu.memory_space<vmem>>, %arg4: memref<1024x128xbf16, #tpu.memory_space<vmem>>, %arg5: memref<1x128xf32, #tpu.memory_space<vmem>>, %arg6: memref<8x128xbf16, #tpu.memory_space<vmem>>) attributes {dimension_semantics = [#tpu.dimension_semantics<parallel>], iteration_bounds = array<i64: 1>, scalar_prefetch = 0 : i64, scratch_operands = 0 : i64, tpu.core_type = #tpu.core_type<tc>, window_params = [{transform_indices = @transform_0, window_bounds = array<i64: 8, 784>}, {pipeline_mode = #tpu.pipeline_mode<synchronous>, transform_indices = @transform_1, window_bounds = array<i64: 784, 1024>}, {pipeline_mode = #tpu.pipeline_mode<synchronous>, transform_indices = @transform_2, window_bounds = array<i64: 1, 1024>}, {pipeline_mode = #tpu.pipeline_mode<synchronous>, transform_indices = @transform_3, window_bounds = array<i64: 1024, 128>}, {pipeline_mode = #tpu.pipeline_mode<synchronous>, transform_indices = @transform_4, window_bounds = array<i64: 1, 128>}, {transform_indices = @transform_5, window_bounds = array<i64: 8, 128>}]} {
    %c0 = arith.constant 0 : index
    %c0_0 = arith.constant 0 : index
    %0 = vector.load %arg1[%c0, %c0_0] : memref<8x784xf32, #tpu.memory_space<vmem>>, vector<8x784xf32>
    %1 = arith.truncf %0 : vector<8x784xf32> to vector<8x784xbf16>
    %c0_1 = arith.constant 0 : index
    %c0_2 = arith.constant 0 : index
    %2 = vector.load %arg2[%c0_1, %c0_2] : memref<784x1024xbf16, #tpu.memory_space<vmem>>, vector<784x1024xbf16>
    %cst = arith.constant dense<0.000000e+00> : vector<8x1024xf32>
    %3 = tpu.matmul %1, %2, %cst {dimension_numbers = #tpu.dot_dimension_numbers<[1], [0], [0], [1], [0, 0, 1, 1], [], []>} : vector<8x784xbf16>, vector<784x1024xbf16>, vector<8x1024xf32> -> vector<8x1024xf32>
    %c0_3 = arith.constant 0 : index
    %c0_4 = arith.constant 0 : index
    %4 = vector.load %arg3[%c0_3, %c0_4] : memref<1x1024xf32, #tpu.memory_space<vmem>>, vector<1x1024xf32>
    %5 = vector.broadcast %4 : vector<1x1024xf32> to vector<8x1024xf32>
    %6 = arith.addf %3, %5 : vector<8x1024xf32>
    %cst_5 = arith.constant 0.000000e+00 : f32
    %7 = vector.broadcast %cst_5 : f32 to vector<8x1024xf32>
    %8 = arith.maximumf %6, %7 : vector<8x1024xf32>
    %9 = arith.truncf %8 : vector<8x1024xf32> to vector<8x1024xbf16>
    %c0_6 = arith.constant 0 : index
    %c0_7 = arith.constant 0 : index
    %10 = vector.load %arg4[%c0_6, %c0_7] : memref<1024x128xbf16, #tpu.memory_space<vmem>>, vector<1024x128xbf16>
    %cst_8 = arith.constant dense<0.000000e+00> : vector<8x128xf32>
    %11 = tpu.matmul %9, %10, %cst_8 {dimension_numbers = #tpu.dot_dimension_numbers<[1], [0], [0], [1], [0, 0, 1, 1], [], []>} : vector<8x1024xbf16>, vector<1024x128xbf16>, vector<8x128xf32> -> vector<8x128xf32>
    %c0_9 = arith.constant 0 : index
    %c0_10 = arith.constant 0 : index
    %12 = vector.load %arg5[%c0_9, %c0_10] : memref<1x128xf32, #tpu.memory_space<vmem>>, vector<1x128xf32>
    %13 = vector.broadcast %12 : vector<1x128xf32> to vector<8x128xf32>
    %14 = arith.addf %11, %13 : vector<8x128xf32>
    %15 = arith.truncf %14 : vector<8x128xf32> to vector<8x128xbf16>
    %c0_11 = arith.constant 0 : index
    %c0_12 = arith.constant 0 : index
    %16 = vector.load %arg6[%c0_11, %c0_12] : memref<8x128xbf16, #tpu.memory_space<vmem>>, vector<8x128xbf16>
    tpu.vector_store %arg6[%c0_11, %c0_12], %15 {strides = array<i32>} : memref<8x128xbf16, #tpu.memory_space<vmem>>, vector<8x128xbf16>,
    return
  }
  func.func @transform_0(%arg0: i32) -> (i32, i32) {
    %c0_i32 = arith.constant 0 : i32
    %c0_i32_0 = arith.constant 0 : i32
    return %arg0, %c0_i32 : i32, i32
  }
  func.func @transform_1(%arg0: i32) -> (i32, i32) {
    %c0_i32 = arith.constant 0 : i32
    %c0_i32_0 = arith.constant 0 : i32
    %c0_i32_1 = arith.constant 0 : i32
    return %c0_i32, %c0_i32_0 : i32, i32
  }
  func.func @transform_2(%arg0: i32) -> (i32, i32) {
    %c0_i32 = arith.constant 0 : i32
    %c0_i32_0 = arith.constant 0 : i32
    %c0_i32_1 = arith.constant 0 : i32
    return %c0_i32, %c0_i32_0 : i32, i32
  }
  func.func @transform_3(%arg0: i32) -> (i32, i32) {
    %c0_i32 = arith.constant 0 : i32
    %c0_i32_0 = arith.constant 0 : i32
    %c0_i32_1 = arith.constant 0 : i32
    return %c0_i32, %c0_i32_0 : i32, i32
  }
  func.func @transform_4(%arg0: i32) -> (i32, i32) {
    %c0_i32 = arith.constant 0 : i32
    %c0_i32_0 = arith.constant 0 : i32
    %c0_i32_1 = arith.constant 0 : i32
    return %c0_i32, %c0_i32_0 : i32, i32
  }
  func.func @transform_5(%arg0: i32) -> (i32, i32) {
    %c0_i32 = arith.constant 0 : i32
    %c0_i32_0 = arith.constant 0 : i32
    return %arg0, %c0_i32 : i32, i32
  }
}

</mosaic_0001>

<bundles_post_ra>
// kernel: mlp_forward.1
= control target key start
LH: loop header
LB: loop body
LE: loop exit
PB: predicated region body
PF: predicated region fallthrough
CT: control target
= control target key end

     0   :  { %10 = vsyncpa [#allocation3], 0  ;;  %s4804_s0 = inlined_call_operand.vmem [shape: f32[8,784], index: 0, kind: input, shape index: {}]   ;;  %s4805_s1 = inlined_call_operand.hbm [shape: bf16[784,1024], index: 1, kind: input, shape index: {}]   ;;  %s4806_s2 = inlined_call_operand.hbm [shape: f32[1,1024], index: 2, kind: input, shape index: {}]   ;;  %s4807_s3 = inlined_call_operand.hbm [shape: bf16[1024,128], index: 3, kind: input, shape index: {}]   ;;  %s4808_s4 = inlined_call_operand.hbm [shape: f32[1,128], index: 4, kind: input, shape index: {}]   ;;  %s4809_s5 = inlined_call_operand.vmem [shape: bf16[8,128], index: 5, kind: output, shape index: {}]  }
   0x1   :  { %11 = vsyncpa [#allocation5], 0 }
   0x2   :  { %12 = vsyncpa [#allocation8], 0  ;;  %s4616_s18 = smov [#allocation4]   ;;  %s4617_s20 = smov [#allocation2]  }
   0x3   :  { %s33_s19 = sshll.u32 %s4616_s18, 4  ;;  %s20_s21 = sshll.u32 %s4617_s20, 4  ;;  %s34_s19 = int_to_ptr.vmem [resolvable:$true] %s33_s19  ;;  %s4655_s21 = int_to_ptr.vmem [resolvable:$true] %s20_s21 }
   0x4   :  { %s4522_s24 = scalar_lea.hbm %s4806_s2, 128 }
   0x5   :  { %p4523_p0 = scmp.ne.s32.totalorder %s4806_s2, %s4522_s24  ;;  %p4526_p1 = scmp.lt.u32.totalorder %s4522_s24, %s4806_s2 }
   0x7   :  { %p4528_p2 = pnand %p4526_p1, %p4523_p0 }
   0x9   :  { %4531 = shalt.err (!%p4528_p2)
}
   0xa   :  { %s4532_s29 = scalar_lea.vmem %s34_s19, 128  ;;  %p4537_p4 = scmp.lt.s32.totalorder %s34_s19, %s34_s19 }
   0xb   :  { %p4533_p3 = scmp.ne.s32.totalorder %s34_s19, %s4532_s29  ;;  %p4538_p5 = scmp.lt.s32.totalorder %s4532_s29, %s4532_s29 }
   0xd   :  { %p4539_p6 = por %p4538_p5, %p4537_p4 }
   0xf   :  { %p4540_p7 = pnand %p4539_p6, %p4533_p3 }
  0x11   :  { %4543 = shalt.err (!%p4540_p7)
}
  0x12   :  { %36 = dma.hbm_to_vmem [thread:$0]  %s4806_s2, 128, %s34_s19, [#allocation5]  }
  0x13   :  { %s4544_s9 = scalar_lea.hbm %s4805_s1, 50176 }
  0x14   :  { %p4545_p8 = scmp.ne.s32.totalorder %s4805_s1, %s4544_s9  ;;  %p4548_p9 = scmp.lt.u32.totalorder %s4544_s9, %s4805_s1 }
  0x16   :  { %p4550_p10 = pnand %p4548_p9, %p4545_p8 }
  0x18   :  { %4553 = shalt.err (!%p4550_p10)
}
  0x19   :  { %s4554_s14 = scalar_lea.vmem %s4655_s21, 50176  ;;  %p4559_p12 = scmp.lt.s32.totalorder %s4655_s21, %s4655_s21 }
  0x1a   :  { %p4555_p11 = scmp.ne.s32.totalorder %s4655_s21, %s4554_s14  ;;  %p4560_p13 = scmp.lt.s32.totalorder %s4554_s14, %s4554_s14 }
  0x1c   :  { %p4561_p0 = por %p4560_p13, %p4559_p12 }
  0x1e   :  { %p4562_p1 = pnand %p4561_p0, %p4555_p11 }
  0x20   :  { %4565 = shalt.err (!%p4562_p1)
}
  0x21   :  { %s4618_s2 = smov 512   ;;  %s4619_s15 = smov 32  }
  0x22   :  { %26 = dma.hbm_to_vmem [thread:$0]  %s4805_s1, 50176, %s4655_s21, [#allocation3], %s4618_s2, %s4618_s2, %s4619_s15  }
  0x23   :  { %s4620_s18 = smov [#allocation6]   ;;  %s4566_s23 = scalar_lea.hbm %s4807_s3, 8192 }
  0x24   :  { %s42_s19 = sshll.u32 %s4620_s18, 4  ;;  %p4567_p2 = scmp.ne.s32.totalorder %s4807_s3, %s4566_s23  ;;  %s43_s19 = int_to_ptr.vmem [resolvable:$true] %s42_s19 }
  0x25   :  { %p4570_p3 = scmp.lt.u32.totalorder %s4566_s23, %s4807_s3 }
  0x27   :  { %p4572_p4 = pnand %p4570_p3, %p4567_p2 }
  0x29   :  { %4575 = shalt.err (!%p4572_p4)
}
  0x2a   :  { %s4576_s28 = scalar_lea.vmem %s43_s19, 8192  ;;  %p4581_p6 = scmp.lt.s32.totalorder %s43_s19, %s43_s19 }
  0x2b   :  { %p4577_p5 = scmp.ne.s32.totalorder %s43_s19, %s4576_s28  ;;  %p4582_p7 = scmp.lt.s32.totalorder %s4576_s28, %s4576_s28 }
  0x2d   :  { %p4583_p8 = por %p4582_p7, %p4581_p6 }
  0x2f   :  { %p4584_p9 = pnand %p4583_p8, %p4577_p5 }
  0x31   :  { %4587 = shalt.err (!%p4584_p9)
}
  0x32   :  { %s4621_s1 = smov 64   ;;  %s4622_s21 = smov 4  }
  0x33   :  { %48 = dma.hbm_to_vmem [thread:$0]  %s4807_s3, 8192, %s43_s19, [#allocation5], %s4621_s1, %s4621_s1, %s4622_s21  }
  0x34   :  { %s4623_s6 = smov [#allocation7]   ;;  %s4588_s10 = scalar_lea.hbm %s4808_s4, 16 }
  0x35   :  { %s55_s7 = sshll.u32 %s4623_s6, 4  ;;  %p4589_p10 = scmp.ne.s32.totalorder %s4808_s4, %s4588_s10  ;;  %s56_s7 = int_to_ptr.vmem [resolvable:$true] %s55_s7 }
  0x36   :  { %p4592_p11 = scmp.lt.u32.totalorder %s4588_s10, %s4808_s4 }
  0x38   :  { %p4594_p12 = pnand %p4592_p11, %p4589_p10 }
  0x3a   :  { %4597 = shalt.err (!%p4594_p12)
}
  0x3b   :  { %s4598_s2 = scalar_lea.vmem %s56_s7, 16  ;;  %s4602_s3 = scalar_lea.vmem %s56_s7, 32 }
  0x3c   :  { %p4599_p13 = scmp.ne.s32.totalorder %s56_s7, %s4598_s2  ;;  %p4603_p0 = scmp.lt.s32.totalorder %s56_s7, %s56_s7 }
  0x3d   :  { %p4604_p1 = scmp.lt.s32.totalorder %s4602_s3, %s4598_s2 }
  0x3f   :  { %p4605_p2 = por %p4604_p1, %p4603_p0 }
  0x41   :  { %p4606_p3 = pnand %p4605_p2, %p4599_p13 }
  0x43   :  { %4609 = shalt.err (!%p4606_p3)
}
  0x44   :  { %58 = dma.hbm_to_vmem [thread:$0]  %s4808_s4, 16, %s56_s7, [#allocation8]  }
  0x45   :  { %4610 = dma.done.wait [#allocation3], 50176  }
  0x46   :  { %4611 = vsyncadd [#allocation3], 4294917120 }
  0x47   :  { %4612 = dma.done.wait [#allocation5], 8320  }
  0x48   :  { %4613 = vsyncadd [#allocation5], 4294958976 }
  0x49   :  { %4614 = dma.done.wait [#allocation8], 16  }
  0x4a   :  { %4615 = vsyncadd [#allocation8], 4294967280  ;;  %v86_v0 = vld [vmem:[#allocation2] sm:$0xff]  ;;  %v87_v2 = vld [vmem:[#allocation2 + $0x8] sm:$0xff]  ;;  %vm2480_vm0 = vcmask 130048  }
  0x4b   :  { %v90_v1 = vld [vmem:[#allocation2 + $0x20] sm:$0xff]  ;;  %v91_v4 = vld [vmem:[#allocation2 + $0x28] sm:$0xff] }
  0x4c   :  { %v3845_v3 = vcombine.high %v86_v0, %v90_v1  ;;  %v3844_v5 = vcombine.low %v86_v0, %v90_v1  ;;  %v94_v6 = vld [vmem:[#allocation2 + $0x40] sm:$0xff]  ;;  %v3847_v8 = vcombine.high %v87_v2, %v91_v4  ;;  %v3846_v9 = vcombine.low %v87_v2, %v91_v4  ;;  %v95_v11 = vld [vmem:[#allocation2 + $0x48] sm:$0xff] }
  0x4d   :  { %v98_v7 = vld [vmem:[#allocation2 + $0x60] sm:$0xff]  ;;  %v99_v12 = vld [vmem:[#allocation2 + $0x68] sm:$0xff] }
  0x4e   :  { %v3853_v10 = vcombine.high %v94_v6, %v98_v7  ;;  %v102_v13 = vld [vmem:[#allocation2 + $0x80] sm:$0xff]  ;;  %2484 = vmatprep.subr.bf16.mxu0 %v3845_v3  ;;  %v3855_v14 = vcombine.high %v95_v11, %v99_v12  ;;  %v103_v16 = vld [vmem:[#allocation2 + $0x88] sm:$0xff]  ;;  %2648 = vmatprep.subr.bf16.mxu1 %v3847_v8  ;;  %v3852_v18 = vcombine.low %v94_v6, %v98_v7 }
  0x4f   :  { %v106_v15 = vld [vmem:[#allocation2 + $0xa0] sm:$0xff]  ;;  %v107_v17 = vld [vmem:[#allocation2 + $0xa8] sm:$0xff]  ;;  %2485 = vmatpush1.bf16.msra.mxu0 %v3844_v5  ;;  %2649 = vmatpush1.bf16.msra.mxu1 %v3846_v9  ;;  %v3854_v19 = vcombine.low %v95_v11, %v99_v12 }
  0x50   :  { %2486 = vmatprep.subr.bf16.mxu0 %v3853_v10  ;;  %v3861_v20 = vcombine.high %v102_v13, %v106_v15  ;;  %2650 = vmatprep.subr.bf16.mxu1 %v3855_v14  ;;  %v3863_v21 = vcombine.high %v103_v16, %v107_v17  ;;  %v110_v22 = vld [vmem:[#allocation2 + $0xc0] sm:$0xff]  ;;  %v111_v24 = vld [vmem:[#allocation2 + $0xc8] sm:$0xff]  ;;  %v3860_v26 = vcombine.low %v102_v13, %v106_v15 }
  0x51   :  { %v114_v23 = vld [vmem:[#allocation2 + $0xe0] sm:$0xff]  ;;  %v115_v25 = vld [vmem:[#allocation2 + $0xe8] sm:$0xff]  ;;  %v3862_v27 = vcombine.low %v103_v16, %v107_v17 }
  0x52   :  { %v3869_v28 = vcombine.high %v110_v22, %v114_v23  ;;  %v3871_v29 = vcombine.high %v111_v24, %v115_v25  ;;  %v118_v30 = vld [vmem:[#allocation2 + $0x100] sm:$0xff]  ;;  %v119_v32 = vld [vmem:[#allocation2 + $0x108] sm:$0xff]  ;;  %v3868_v34 = vcombine.low %v110_v22, %v114_v23  ;;  %v3870_v35 = vcombine.low %v111_v24, %v115_v25 }
  0x53   :  { %2487 = vmatpush1.bf16.msra.mxu0 %v3852_v18  ;;  %2651 = vmatpush1.bf16.msra.mxu1 %v3854_v19  ;;  %v122_v31 = vld [vmem:[#allocation2 + $0x120] sm:$0xff]  ;;  %v123_v33 = vld [vmem:[#allocation2 + $0x128] sm:$0xff] }
  0x54   :  { %2488 = vmatprep.subr.bf16.mxu0 %v3861_v20  ;;  %2652 = vmatprep.subr.bf16.mxu1 %v3863_v21  ;;  %v3877_v36 = vcombine.high %v118_v30, %v122_v31  ;;  %v3879_v37 = vcombine.high %v119_v32, %v123_v33  ;;  %v126_v38 = vld [vmem:[#allocation2 + $0x140] sm:$0xff]  ;;  %v127_v40 = vld [vmem:[#allocation2 + $0x148] sm:$0xff]  ;;  %v3876_v42 = vcombine.low %v118_v30, %v122_v31 }
  0x55   :  { %v130_v39 = vld [vmem:[#allocation2 + $0x160] sm:$0xff]  ;;  %v131_v41 = vld [vmem:[#allocation2 + $0x168] sm:$0xff]  ;;  %v3878_v43 = vcombine.low %v119_v32, %v123_v33 }
  0x56   :  { %v3885_v44 = vcombine.high %v126_v38, %v130_v39  ;;  %v3887_v45 = vcombine.high %v127_v40, %v131_v41  ;;  %v134_v46 = vld [vmem:[#allocation2 + $0x180] sm:$0xff]  ;;  %v135_v48 = vld [vmem:[#allocation2 + $0x188] sm:$0xff]  ;;  %v3884_v50 = vcombine.low %v126_v38, %v130_v39  ;;  %v3886_v51 = vcombine.low %v127_v40, %v131_v41 }
  0x57   :  { %2489 = vmatpush1.bf16.msra.mxu0 %v3860_v26  ;;  %2653 = vmatpush1.bf16.msra.mxu1 %v3862_v27  ;;  %v138_v47 = vld [vmem:[#allocation2 + $0x1a0] sm:$0xff]  ;;  %v139_v49 = vld [vmem:[#allocation2 + $0x1a8] sm:$0xff] }
  0x58   :  { %2490 = vmatprep.subr.bf16.mxu0 %v3869_v28  ;;  %2654 = vmatprep.subr.bf16.mxu1 %v3871_v29  ;;  %v3893_v52 = vcombine.high %v134_v46, %v138_v47  ;;  %v73_v53 = vld [vmem:[%s4804_s0 + $0x8] sm:$0xff]  ;;  %v3895_v54 = vcombine.high %v135_v48, %v139_v49  ;;  %v142_v55 = vld [vmem:[#allocation2 + $0x1c0] sm:$0xff]  ;;  %v3892_v60 = vcombine.low %v134_v46, %v138_v47 }
  0x59   :  { %v146_v56 = vld [vmem:[#allocation2 + $0x1e0] sm:$0xff]  ;;  %v4713_v57 = vpack.c.bf16 %v73_v53, %v73_v53  ;;  %v143_v58 = vld [vmem:[#allocation2 + $0x1c8] sm:$0xff]  ;;  %v3894_v61 = vcombine.low %v135_v48, %v139_v49 }
  0x5a   :  { %v147_v59 = vld [vmem:[#allocation2 + $0x1e8] sm:$0xff]  ;;  %v3901_v62 = vcombine.high %v142_v55, %v146_v56  ;;  %v150_v0 = vld [vmem:[#allocation2 + $0x200] sm:$0xff]  ;;  %v3900_v4 = vcombine.low %v142_v55, %v146_v56 }
  0x5b   :  { %2491 = vmatpush1.bf16.msra.mxu0 %v3868_v34  ;;  %2655 = vmatpush1.bf16.msra.mxu1 %v3870_v35  ;;  %v3903_v63 = vcombine.high %v143_v58, %v147_v59  ;;  %v154_v1 = vld [vmem:[#allocation2 + $0x220] sm:$0xff]  ;;  %v151_v2 = vld [vmem:[#allocation2 + $0x208] sm:$0xff]  ;;  %v3902_v5 = vcombine.low %v143_v58, %v147_v59 }
  0x5c   :  { %2492 = vmatprep.subr.bf16.mxu0 %v3877_v36  ;;  %2656 = vmatprep.subr.bf16.mxu1 %v3879_v37  ;;  %v155_v3 = vld [vmem:[#allocation2 + $0x228] sm:$0xff]  ;;  %v3909_v6 = vcombine.high %v150_v0, %v154_v1  ;;  %v158_v8 = vld [vmem:[#allocation2 + $0x240] sm:$0xff]  ;;  %v3908_v12 = vcombine.low %v150_v0, %v154_v1 }
  0x5d   :  { %2516 = vmatprep.mubr.bf16.mxu0 %v4713_v57  ;;  %2680 = vmatprep.mubr.bf16.mxu1 %v4713_v57  ;;  %v3911_v7 = vcombine.high %v151_v2, %v155_v3  ;;  %v162_v9 = vld [vmem:[#allocation2 + $0x260] sm:$0xff]  ;;  %v159_v10 = vld [vmem:[#allocation2 + $0x248] sm:$0xff]  ;;  %v3910_v13 = vcombine.low %v151_v2, %v155_v3 }
  0x5e   :  { %v163_v11 = vld [vmem:[#allocation2 + $0x268] sm:$0xff]  ;;  %v3917_v14 = vcombine.high %v158_v8, %v162_v9  ;;  %v166_v16 = vld [vmem:[#allocation2 + $0x280] sm:$0xff]  ;;  %v3916_v20 = vcombine.low %v158_v8, %v162_v9 }
  0x5f   :  { %2493 = vmatpush1.bf16.msra.mxu0 %v3876_v42  ;;  %2657 = vmatpush1.bf16.msra.mxu1 %v3878_v43  ;;  %v3919_v15 = vcombine.high %v159_v10, %v163_v11  ;;  %v170_v17 = vld [vmem:[#allocation2 + $0x2a0] sm:$0xff]  ;;  %v167_v18 = vld [vmem:[#allocation2 + $0x288] sm:$0xff]  ;;  %v3918_v21 = vcombine.low %v159_v10, %v163_v11 }
  0x60   :  { %2494 = vmatprep.subr.bf16.mxu0 %v3885_v44  ;;  %2658 = vmatprep.subr.bf16.mxu1 %v3887_v45  ;;  %v171_v19 = vld [vmem:[#allocation2 + $0x2a8] sm:$0xff]  ;;  %v3925_v22 = vcombine.high %v166_v16, %v170_v17  ;;  %v174_v24 = vld [vmem:[#allocation2 + $0x2c0] sm:$0xff]  ;;  %v3924_v28 = vcombine.low %v166_v16, %v170_v17 }
  0x61   :  { %v3927_v23 = vcombine.high %v167_v18, %v171_v19  ;;  %v178_v25 = vld [vmem:[#allocation2 + $0x2e0] sm:$0xff]  ;;  %v175_v26 = vld [vmem:[#allocation2 + $0x2c8] sm:$0xff]  ;;  %v3926_v29 = vcombine.low %v167_v18, %v171_v19 }
  0x62   :  { %v179_v27 = vld [vmem:[#allocation2 + $0x2e8] sm:$0xff]  ;;  %v3933_v30 = vcombine.high %v174_v24, %v178_v25  ;;  %v182_v32 = vld [vmem:[#allocation2 + $0x300] sm:$0xff]  ;;  %v3932_v36 = vcombine.low %v174_v24, %v178_v25 }
  0x63   :  { %2495 = vmatpush1.bf16.msra.mxu0 %v3884_v50  ;;  %2659 = vmatpush1.bf16.msra.mxu1 %v3886_v51  ;;  %v3935_v31 = vcombine.high %v175_v26, %v179_v27  ;;  %v186_v33 = vld [vmem:[#allocation2 + $0x320] sm:$0xff]  ;;  %v183_v34 = vld [vmem:[#allocation2 + $0x308] sm:$0xff]  ;;  %v3934_v37 = vcombine.low %v175_v26, %v179_v27 }
  0x64   :  { %2496 = vmatprep.subr.bf16.mxu0 %v3893_v52  ;;  %2660 = vmatprep.subr.bf16.mxu1 %v3895_v54  ;;  %v187_v35 = vld [vmem:[#allocation2 + $0x328] sm:$0xff]  ;;  %v3941_v38 = vcombine.high %v182_v32, %v186_v33  ;;  %v190_v40 = vld [vmem:[#allocation2 + $0x340] sm:$0xff]  ;;  %v3940_v44 = vcombine.low %v182_v32, %v186_v33 }
  0x65   :  { %v3943_v39 = vcombine.high %v183_v34, %v187_v35  ;;  %v194_v41 = vld [vmem:[#allocation2 + $0x360] sm:$0xff]  ;;  %v191_v42 = vld [vmem:[#allocation2 + $0x348] sm:$0xff]  ;;  %v3942_v45 = vcombine.low %v183_v34, %v187_v35 }
  0x66   :  { %v195_v43 = vld [vmem:[#allocation2 + $0x368] sm:$0xff]  ;;  %v3949_v46 = vcombine.high %v190_v40, %v194_v41  ;;  %v198_v48 = vld [vmem:[#allocation2 + $0x380] sm:$0xff]  ;;  %v3948_v52 = vcombine.low %v190_v40, %v194_v41 }
  0x67   :  { %2497 = vmatpush1.bf16.msra.mxu0 %v3892_v60  ;;  %2661 = vmatpush1.bf16.msra.mxu1 %v3894_v61  ;;  %v3951_v47 = vcombine.high %v191_v42, %v195_v43  ;;  %v202_v49 = vld [vmem:[#allocation2 + $0x3a0] sm:$0xff]  ;;  %v199_v50 = vld [vmem:[#allocation2 + $0x388] sm:$0xff]  ;;  %v3950_v53 = vcombine.low %v191_v42, %v195_v43 }
  0x68   :  { %2498 = vmatprep.subr.bf16.mxu0 %v3901_v62  ;;  %2662 = vmatprep.subr.bf16.mxu1 %v3903_v63  ;;  %v203_v51 = vld [vmem:[#allocation2 + $0x3a8] sm:$0xff]  ;;  %v3957_v54 = vcombine.high %v198_v48, %v202_v49  ;;  %v206_v56 = vld [vmem:[#allocation2 + $0x3c0] sm:$0xff]  ;;  %v3956_v61 = vcombine.low %v198_v48, %v202_v49 }
  0x69   :  { %v3959_v55 = vcombine.high %v199_v50, %v203_v51  ;;  %v210_v58 = vld [vmem:[#allocation2 + $0x3e0] sm:$0xff]  ;;  %v207_v59 = vld [vmem:[#allocation2 + $0x3c8] sm:$0xff]  ;;  %v3958_v62 = vcombine.low %v199_v50, %v203_v51 }
  0x6a   :  { %v211_v60 = vld [vmem:[#allocation2 + $0x3e8] sm:$0xff]  ;;  %v3965_v63 = vcombine.high %v206_v56, %v210_v58  ;;  %v214_v1 = vld [vmem:[#allocation2 + $0x400] sm:$0xff] }
  0x6b   :  { %2499 = vmatpush1.bf16.msra.mxu0 %v3900_v4  ;;  %2663 = vmatpush1.bf16.msra.mxu1 %v3902_v5  ;;  %v3967_v0 = vcombine.high %v207_v59, %v211_v60  ;;  %v218_v2 = vld [vmem:[#allocation2 + $0x420] sm:$0xff]  ;;  %v215_v3 = vld [vmem:[#allocation2 + $0x408] sm:$0xff]  ;;  %v3964_v5 = vcombine.low %v206_v56, %v210_v58 }
  0x6c   :  { %2500 = vmatprep.subr.bf16.mxu0 %v3909_v6  ;;  %2664 = vmatprep.subr.bf16.mxu1 %v3911_v7  ;;  %v219_v4 = vld [vmem:[#allocation2 + $0x428] sm:$0xff]  ;;  %v72_v6 = vld [vmem:[%s4804_s0] sm:$0xff]  ;;  %v3966_v7 = vcombine.low %v207_v59, %v211_v60  ;;  %v3973_v8 = vcombine.high %v214_v1, %v218_v2  ;;  %v3972_v16 = vcombine.low %v214_v1, %v218_v2 }
  0x6d   :  { %v3975_v9 = vcombine.high %v215_v3, %v219_v4  ;;  %v222_v10 = vld [vmem:[#allocation2 + $0x440] sm:$0xff]  ;;  %v3974_v17 = vcombine.low %v215_v3, %v219_v4  ;;  %v235_v24 = vld [vmem:[#allocation2 + $0x4a8] sm:$0xff] }
  0x6e   :  { %v226_v11 = vld [vmem:[#allocation2 + $0x460] sm:$0xff]  ;;  %v243_v32 = vld [vmem:[#allocation2 + $0x4e8] sm:$0xff] }
  0x6f   :  { %2501 = vmatpush1.bf16.msra.mxu0 %v3908_v12  ;;  %2665 = vmatpush1.bf16.msra.mxu1 %v3910_v13  ;;  %v4720_v12 = vpack.c.bf16 %v72_v6, %v72_v6  ;;  %v223_v13 = vld [vmem:[#allocation2 + $0x448] sm:$0xff]  ;;  %v3981_v18 = vcombine.high %v222_v10, %v226_v11  ;;  %v230_v19 = vld [vmem:[#allocation2 + $0x480] sm:$0xff]  ;;  %v3980_v25 = vcombine.low %v222_v10, %v226_v11 }
  0x70   :  { %2502 = vmatprep.subr.bf16.mxu0 %v3917_v14  ;;  %2666 = vmatprep.subr.bf16.mxu1 %v3919_v15  ;;  %v227_v14 = vld [vmem:[#allocation2 + $0x468] sm:$0xff]  ;;  %v75_v15 = vld [vmem:[%s4804_s0 + $0x18] sm:$0xff]  ;;  %v246_v34 = vld [vmem:[#allocation2 + $0x500] sm:$0xff] }
  0x71   :  { %v3982_v26 = vcombine.low %v223_v13, %v227_v14  ;;  %v250_v35 = vld [vmem:[#allocation2 + $0x520] sm:$0xff]  ;;  %v267_v56 = vld [vmem:[#allocation2 + $0x5a8] sm:$0xff] }
  0x72   :  { %v254_v42 = vld [vmem:[#allocation2 + $0x540] sm:$0xff]  ;;  %v4004_v49 = vcombine.low %v246_v34, %v250_v35  ;;  %v275_v1 = vld [vmem:[#allocation2 + $0x5e8] sm:$0xff] }
  0x73   :  { %2503 = vmatpush1.bf16.msra.mxu0 %v3916_v20  ;;  %2667 = vmatpush1.bf16.msra.mxu1 %v3918_v21  ;;  %v234_v20 = vld [vmem:[#allocation2 + $0x4a0] sm:$0xff]  ;;  %v3983_v21 = vcombine.high %v223_v13, %v227_v14 }
  0x74   :  { %2504 = vmatprep.subr.bf16.mxu0 %v3925_v22  ;;  %2668 = vmatprep.subr.bf16.mxu1 %v3927_v23  ;;  %v4725_v22 = vpack.c.bf16 %v75_v15, %v75_v15  ;;  %v231_v23 = vld [vmem:[#allocation2 + $0x488] sm:$0xff]  ;;  %v3989_v27 = vcombine.high %v230_v19, %v234_v20  ;;  %v3988_v33 = vcombine.low %v230_v19, %v234_v20  ;;  %v258_v43 = vld [vmem:[#allocation2 + $0x560] sm:$0xff] }
  0x75   :  { %v4013_v51 = vcombine.high %v254_v42, %v258_v43  ;;  %v4012_v58 = vcombine.low %v254_v42, %v258_v43  ;;  %v282_v6 = vld [vmem:[#allocation2 + $0x620] sm:$0xff]  ;;  %v315_v43 = vld [vmem:[#allocation2 + $0x728] sm:$0xff] }
  0x76   :  { %v286_v14 = vld [vmem:[#allocation2 + $0x640] sm:$0xff] }
  0x77   :  { %2505 = vmatpush1.bf16.msra.mxu0 %v3924_v28  ;;  %2669 = vmatpush1.bf16.msra.mxu1 %v3926_v29  ;;  %v3991_v28 = vcombine.high %v231_v23, %v235_v24  ;;  %v238_v29 = vld [vmem:[#allocation2 + $0x4c0] sm:$0xff] }
  0x78   :  { %2506 = vmatprep.subr.bf16.mxu0 %v3933_v30  ;;  %2670 = vmatprep.subr.bf16.mxu1 %v3935_v31  ;;  %v242_v30 = vld [vmem:[#allocation2 + $0x4e0] sm:$0xff]  ;;  %v239_v31 = vld [vmem:[#allocation2 + $0x4c8] sm:$0xff] }
  0x79   :  { %v3999_v40 = vcombine.high %v239_v31, %v243_v32  ;;  %v3996_v41 = vcombine.low %v238_v29, %v242_v30  ;;  %v290_v15 = vld [vmem:[#allocation2 + $0x660] sm:$0xff] }
  0x7b   :  { %2507 = vmatpush1.bf16.msra.mxu0 %v3932_v36  ;;  %2671 = vmatpush1.bf16.msra.mxu1 %v3934_v37  ;;  %v3990_v36 = vcombine.low %v231_v23, %v235_v24  ;;  %v3997_v37 = vcombine.high %v238_v29, %v242_v30  ;;  %v294_v23 = vld [vmem:[#allocation2 + $0x680] sm:$0xff] }
  0x7c   :  { %2508 = vmatprep.subr.bf16.mxu0 %v3941_v38  ;;  %2672 = vmatprep.subr.bf16.mxu1 %v3943_v39  ;;  %v247_v38 = vld [vmem:[#allocation2 + $0x508] sm:$0xff]  ;;  %v298_v24 = vld [vmem:[#allocation2 + $0x6a0] sm:$0xff] }
  0x7d   :  { %v251_v39 = vld [vmem:[#allocation2 + $0x528] sm:$0xff]  ;;  %v4053_v30 = vcombine.high %v294_v23, %v298_v24 }
  0x7e   :  { %v4007_v48 = vcombine.high %v247_v38, %v251_v39  ;;  %v4006_v50 = vcombine.low %v247_v38, %v251_v39  ;;  %v310_v39 = vld [vmem:[#allocation2 + $0x700] sm:$0xff] }
  0x7f   :  { %2509 = vmatpush1.bf16.msra.mxu0 %v3940_v44  ;;  %2673 = vmatpush1.bf16.msra.mxu1 %v3942_v45  ;;  %v3998_v44 = vcombine.low %v239_v31, %v243_v32  ;;  %v4005_v45 = vcombine.high %v246_v34, %v250_v35  ;;  %v302_v31 = vld [vmem:[#allocation2 + $0x6c0] sm:$0xff]  ;;  %v307_v35 = vld [vmem:[#allocation2 + $0x6e8] sm:$0xff] }
  0x80   :  { %2510 = vmatprep.subr.bf16.mxu0 %v3949_v46  ;;  %2674 = vmatprep.subr.bf16.mxu1 %v3951_v47  ;;  %v255_v46 = vld [vmem:[#allocation2 + $0x548] sm:$0xff]  ;;  %v306_v32 = vld [vmem:[#allocation2 + $0x6e0] sm:$0xff] }
  0x81   :  { %v259_v47 = vld [vmem:[#allocation2 + $0x568] sm:$0xff]  ;;  %v4061_v38 = vcombine.high %v302_v31, %v306_v32 }
  0x82   :  { %v4014_v59 = vcombine.low %v255_v46, %v259_v47 }
  0x83   :  { %2511 = vmatpush1.bf16.msra.mxu0 %v3948_v52  ;;  %2675 = vmatpush1.bf16.msra.mxu1 %v3950_v53  ;;  %v262_v52 = vld [vmem:[#allocation2 + $0x580] sm:$0xff] }
  0x84   :  { %2512 = vmatprep.subr.bf16.mxu0 %v3957_v54  ;;  %2676 = vmatprep.subr.bf16.mxu1 %v3959_v55  ;;  %v266_v53 = vld [vmem:[#allocation2 + $0x5a0] sm:$0xff]  ;;  %v263_v54 = vld [vmem:[#allocation2 + $0x588] sm:$0xff]  ;;  %v4015_v55 = vcombine.high %v255_v46, %v259_v47 }
  0x85   :  { %v4021_v60 = vcombine.high %v262_v52, %v266_v53  ;;  %v4020_v2 = vcombine.low %v262_v52, %v266_v53  ;;  %v4022_v3 = vcombine.low %v263_v54, %v267_v56  ;;  %v318_v47 = vld [vmem:[#allocation2 + $0x740] sm:$0xff] }
  0x87   :  { %2513 = vmatpush1.bf16.msra.mxu0 %v3956_v61  ;;  %2677 = vmatpush1.bf16.msra.mxu1 %v3958_v62  ;;  %v270_v61 = vld [vmem:[#allocation2 + $0x5c0] sm:$0xff] }
  0x88   :  { %2514 = vmatprep.subr.bf16.mxu0 %v3965_v63  ;;  %2678 = vmatprep.subr.bf16.mxu1 %v3967_v0  ;;  %v274_v62 = vld [vmem:[#allocation2 + $0x5e0] sm:$0xff]  ;;  %v271_v63 = vld [vmem:[#allocation2 + $0x5c8] sm:$0xff]  ;;  %v4023_v0 = vcombine.high %v263_v54, %v267_v56 }
  0x89   :  { %v4029_v4 = vcombine.high %v270_v61, %v274_v62  ;;  %v4028_v10 = vcombine.low %v270_v61, %v274_v62  ;;  %v4030_v11 = vcombine.low %v271_v63, %v275_v1  ;;  %v330_v56 = vld [vmem:[#allocation2 + $0x7a0] sm:$0xff] }
  0x8b   :  { %2515 = vmatpush1.bf16.msra.mxu0 %v3964_v5  ;;  %2679 = vmatpush1.bf16.msra.mxu1 %v3966_v7  ;;  %v278_v5 = vld [vmem:[#allocation2 + $0x600] sm:$0xff]  ;;  %v279_v7 = vld [vmem:[#allocation2 + $0x608] sm:$0xff] }
  0x8c   :  { %2525 = vmatprep.subr.bf16.mxu0 %v3973_v8  ;;  %2689 = vmatprep.subr.bf16.mxu1 %v3975_v9  ;;  %v4031_v8 = vcombine.high %v271_v63, %v275_v1  ;;  %v283_v9 = vld [vmem:[#allocation2 + $0x628] sm:$0xff]  ;;  %v4037_v13 = vcombine.high %v278_v5, %v282_v6  ;;  %v4036_v19 = vcombine.low %v278_v5, %v282_v6  ;;  %v338_v1 = vld [vmem:[#allocation2 + $0x7e0] sm:$0xff] }
  0x8d   :  { %v4038_v20 = vcombine.low %v279_v7, %v283_v9  ;;  %v342_v6 = vld [vmem:[#allocation2 + $0x800] sm:$0xff] }
  0x8e   :  { %2517 = vmatmul.mubr.bf16.vlgmr.msra.gmra.mrb[0].mxu0 %v4720_v12  ;;  %2681 = vmatmul.mubr.bf16.vlgmr.msra.gmra.mrb[0].mxu1 %v4720_v12 }
  0x8f   :  { %2526 = vmatpush1.bf16.msra.mxu0 %v3972_v16  ;;  %2690 = vmatpush1.bf16.msra.mxu1 %v3974_v17  ;;  %v287_v16 = vld [vmem:[#allocation2 + $0x648] sm:$0xff]  ;;  %v4039_v17 = vcombine.high %v279_v7, %v283_v9  ;;  %v346_v9 = vld [vmem:[#allocation2 + $0x820] sm:$0xff] }
  0x90   :  { %2527 = vmatprep.subr.bf16.mxu0 %v3981_v18  ;;  %2691 = vmatprep.subr.bf16.mxu1 %v3983_v21  ;;  %v291_v18 = vld [vmem:[#allocation2 + $0x668] sm:$0xff]  ;;  %v4045_v21 = vcombine.high %v286_v14, %v290_v15 }
  0x91   :  { %2557 = vmatprep.mubr.bf16.mxu0 %v4725_v22  ;;  %2721 = vmatprep.mubr.bf16.mxu1 %v4725_v22  ;;  %v4046_v29 = vcombine.low %v287_v16, %v291_v18 }
  0x93   :  { %2528 = vmatpush1.bf16.msra.mxu0 %v3980_v25  ;;  %2692 = vmatpush1.bf16.msra.mxu1 %v3982_v26  ;;  %v295_v25 = vld [vmem:[#allocation2 + $0x688] sm:$0xff]  ;;  %v4047_v26 = vcombine.high %v287_v16, %v291_v18  ;;  %v350_v16 = vld [vmem:[#allocation2 + $0x840] sm:$0xff]  ;;  %v4101_v18 = vcombine.high %v342_v6, %v346_v9 }
  0x94   :  { %2529 = vmatprep.subr.bf16.mxu0 %v3989_v27  ;;  %2693 = vmatprep.subr.bf16.mxu1 %v3991_v28  ;;  %v299_v27 = vld [vmem:[#allocation2 + $0x6a8] sm:$0xff]  ;;  %v4044_v28 = vcombine.low %v286_v14, %v290_v15  ;;  %v74_v14 = vld [vmem:[%s4804_s0 + $0x10] sm:$0xff] }
  0x95   :  { %v4055_v34 = vcombine.high %v295_v25, %v299_v27 }
  0x97   :  { %2530 = vmatpush1.bf16.msra.mxu0 %v3988_v33  ;;  %2694 = vmatpush1.bf16.msra.mxu1 %v3990_v36  ;;  %v303_v33 = vld [vmem:[#allocation2 + $0x6c8] sm:$0xff]  ;;  %v4052_v36 = vcombine.low %v294_v23, %v298_v24 }
  0x98   :  { %2531 = vmatprep.subr.bf16.mxu0 %v3997_v37  ;;  %2695 = vmatprep.subr.bf16.mxu1 %v3999_v40  ;;  %v4054_v37 = vcombine.low %v295_v25, %v299_v27  ;;  %v314_v40 = vld [vmem:[#allocation2 + $0x720] sm:$0xff]  ;;  %v4063_v42 = vcombine.high %v303_v33, %v307_v35  ;;  %v77_v24 = vld [vmem:[%s4804_s0 + $0x28] sm:$0xff]  ;;  %v4737_v25 = vpack.c.bf16 %v74_v14, %v74_v14 }
  0x99   :  { %v4069_v46 = vcombine.high %v310_v39, %v314_v40  ;;  %v4068_v52 = vcombine.low %v310_v39, %v314_v40  ;;  %v366_v39 = vld [vmem:[#allocation2 + $0x8c0] sm:$0xff] }
  0x9a   :  { %v370_v40 = vld [vmem:[#allocation2 + $0x8e0] sm:$0xff] }
  0x9b   :  { %2532 = vmatpush1.bf16.msra.mxu0 %v3996_v41  ;;  %2696 = vmatpush1.bf16.msra.mxu1 %v3998_v44  ;;  %v311_v41 = vld [vmem:[#allocation2 + $0x708] sm:$0xff]  ;;  %v4060_v44 = vcombine.low %v302_v31, %v306_v32  ;;  %v362_v31 = vld [vmem:[#allocation2 + $0x8a0] sm:$0xff]  ;;  %v4739_v32 = vpack.c.bf16 %v77_v24, %v77_v24 }
  0x9c   :  { %2533 = vmatprep.subr.bf16.mxu0 %v4005_v45  ;;  %2697 = vmatprep.subr.bf16.mxu1 %v4007_v48  ;;  %v4062_v45 = vcombine.low %v303_v33, %v307_v35  ;;  %v322_v48 = vld [vmem:[#allocation2 + $0x760] sm:$0xff]  ;;  %v4070_v53 = vcombine.low %v311_v41, %v315_v43  ;;  %v359_v33 = vld [vmem:[#allocation2 + $0x888] sm:$0xff] }
  0x9d   :  { %v4077_v54 = vcombine.high %v318_v47, %v322_v48  ;;  %v4076_v61 = vcombine.low %v318_v47, %v322_v48  ;;  %v374_v47 = vld [vmem:[#allocation2 + $0x900] sm:$0xff] }
  0x9e   :  { %v378_v48 = vld [vmem:[#allocation2 + $0x920] sm:$0xff] }
  0x9f   :  { %2534 = vmatpush1.bf16.msra.mxu0 %v4004_v49  ;;  %2698 = vmatpush1.bf16.msra.mxu1 %v4006_v50  ;;  %v319_v49 = vld [vmem:[#allocation2 + $0x748] sm:$0xff]  ;;  %v4071_v50 = vcombine.high %v311_v41, %v315_v43 }
  0xa0   :  { %2535 = vmatprep.subr.bf16.mxu0 %v4013_v51  ;;  %2699 = vmatprep.subr.bf16.mxu1 %v4015_v55  ;;  %v323_v51 = vld [vmem:[#allocation2 + $0x768] sm:$0xff]  ;;  %v326_v55 = vld [vmem:[#allocation2 + $0x780] sm:$0xff] }
  0xa1   :  { %v4078_v62 = vcombine.low %v319_v49, %v323_v51  ;;  %v4085_v63 = vcombine.high %v326_v55, %v330_v56  ;;  %v4084_v5 = vcombine.low %v326_v55, %v330_v56  ;;  %v367_v41 = vld [vmem:[#allocation2 + $0x8c8] sm:$0xff]  ;;  %v382_v55 = vld [vmem:[#allocation2 + $0x940] sm:$0xff] }
  0xa2   :  { %v386_v56 = vld [vmem:[#allocation2 + $0x960] sm:$0xff] }
  0xa3   :  { %2536 = vmatpush1.bf16.msra.mxu0 %v4012_v58  ;;  %2700 = vmatpush1.bf16.msra.mxu1 %v4014_v59  ;;  %v327_v58 = vld [vmem:[#allocation2 + $0x788] sm:$0xff]  ;;  %v4079_v59 = vcombine.high %v319_v49, %v323_v51  ;;  %v4124_v51 = vcombine.low %v366_v39, %v370_v40 }
  0xa4   :  { %2537 = vmatprep.subr.bf16.mxu0 %v4021_v60  ;;  %2701 = vmatprep.subr.bf16.mxu1 %v4023_v0  ;;  %v331_v60 = vld [vmem:[#allocation2 + $0x7a8] sm:$0xff]  ;;  %v334_v0 = vld [vmem:[#allocation2 + $0x7c0] sm:$0xff] }
  0xa5   :  { %v4086_v7 = vcombine.low %v327_v58, %v331_v60  ;;  %v4092_v15 = vcombine.low %v334_v0, %v338_v1  ;;  %v375_v49 = vld [vmem:[#allocation2 + $0x908] sm:$0xff] }
  0xa7   :  { %2538 = vmatpush1.bf16.msra.mxu0 %v4020_v2  ;;  %2702 = vmatpush1.bf16.msra.mxu1 %v4022_v3  ;;  %v335_v2 = vld [vmem:[#allocation2 + $0x7c8] sm:$0xff]  ;;  %v4087_v3 = vcombine.high %v327_v58, %v331_v60  ;;  %v4132_v60 = vcombine.low %v374_v47, %v378_v48 }
  0xa8   :  { %2539 = vmatprep.subr.bf16.mxu0 %v4029_v4  ;;  %2703 = vmatprep.subr.bf16.mxu1 %v4031_v8  ;;  %v339_v4 = vld [vmem:[#allocation2 + $0x7e8] sm:$0xff]  ;;  %v4093_v8 = vcombine.high %v334_v0, %v338_v1  ;;  %v390_v0 = vld [vmem:[#allocation2 + $0x980] sm:$0xff] }
  0xa9   :  { %v383_v58 = vld [vmem:[#allocation2 + $0x948] sm:$0xff]  ;;  %v394_v1 = vld [vmem:[#allocation2 + $0x9a0] sm:$0xff] }
  0xab   :  { %2540 = vmatpush1.bf16.msra.mxu0 %v4028_v10  ;;  %2704 = vmatpush1.bf16.msra.mxu1 %v4030_v11  ;;  %v343_v10 = vld [vmem:[#allocation2 + $0x808] sm:$0xff] }
  0xac   :  { %2541 = vmatprep.subr.bf16.mxu0 %v4037_v13  ;;  %2705 = vmatprep.subr.bf16.mxu1 %v4039_v17  ;;  %v347_v11 = vld [vmem:[#allocation2 + $0x828] sm:$0xff]  ;;  %v4095_v13 = vcombine.high %v335_v2, %v339_v4  ;;  %v4094_v17 = vcombine.low %v335_v2, %v339_v4  ;;  %v4140_v4 = vcombine.low %v382_v55, %v386_v56 }
  0xad   :  { %v4103_v23 = vcombine.high %v343_v10, %v347_v11  ;;  %v4102_v27 = vcombine.low %v343_v10, %v347_v11  ;;  %v391_v2 = vld [vmem:[#allocation2 + $0x988] sm:$0xff] }
  0xae   :  { %v399_v10 = vld [vmem:[#allocation2 + $0x9c8] sm:$0xff] }
  0xaf   :  { %2542 = vmatpush1.bf16.msra.mxu0 %v4036_v19  ;;  %2706 = vmatpush1.bf16.msra.mxu1 %v4038_v20  ;;  %v354_v19 = vld [vmem:[#allocation2 + $0x860] sm:$0xff]  ;;  %v351_v20 = vld [vmem:[#allocation2 + $0x848] sm:$0xff] }
  0xb0   :  { %2543 = vmatprep.subr.bf16.mxu0 %v4045_v21  ;;  %2707 = vmatprep.subr.bf16.mxu1 %v4047_v26  ;;  %v355_v21 = vld [vmem:[#allocation2 + $0x868] sm:$0xff]  ;;  %v4100_v26 = vcombine.low %v342_v6, %v346_v9  ;;  %v4108_v35 = vcombine.low %v350_v16, %v354_v19  ;;  %v4149_v6 = vcombine.high %v390_v0, %v394_v1  ;;  %v402_v9 = vld [vmem:[#allocation2 + $0x9e0] sm:$0xff] }
  0xb1   :  { %v403_v11 = vld [vmem:[#allocation2 + $0x9e8] sm:$0xff] }
  0xb3   :  { %2544 = vmatpush1.bf16.msra.mxu0 %v4044_v28  ;;  %2708 = vmatpush1.bf16.msra.mxu1 %v4046_v29  ;;  %v4109_v28 = vcombine.high %v350_v16, %v354_v19  ;;  %v4111_v29 = vcombine.high %v351_v20, %v355_v21  ;;  %v4159_v16 = vcombine.high %v399_v10, %v403_v11  ;;  %v407_v19 = vld [vmem:[#allocation2 + $0xa08] sm:$0xff] }
  0xb4   :  { %2545 = vmatprep.subr.bf16.mxu0 %v4053_v30  ;;  %2709 = vmatprep.subr.bf16.mxu1 %v4055_v34  ;;  %v358_v30 = vld [vmem:[#allocation2 + $0x880] sm:$0xff]  ;;  %v363_v34 = vld [vmem:[#allocation2 + $0x8a8] sm:$0xff] }
  0xb5   :  { %v4116_v43 = vcombine.low %v358_v30, %v362_v31 }
  0xb7   :  { %2546 = vmatpush1.bf16.msra.mxu0 %v4052_v36  ;;  %2710 = vmatpush1.bf16.msra.mxu1 %v4054_v37  ;;  %v4110_v36 = vcombine.low %v351_v20, %v355_v21  ;;  %v4117_v37 = vcombine.high %v358_v30, %v362_v31  ;;  %v411_v20 = vld [vmem:[#allocation2 + $0xa28] sm:$0xff] }
  0xb8   :  { %2547 = vmatprep.subr.bf16.mxu0 %v4061_v38  ;;  %2711 = vmatprep.subr.bf16.mxu1 %v4063_v42  ;;  %v4119_v38 = vcombine.high %v359_v33, %v363_v34  ;;  %v371_v42 = vld [vmem:[#allocation2 + $0x8e8] sm:$0xff] }
  0xb9   :  { %v419_v30 = vld [vmem:[#allocation2 + $0xa68] sm:$0xff] }
  0xbb   :  { %2548 = vmatpush1.bf16.msra.mxu0 %v4060_v44  ;;  %2712 = vmatpush1.bf16.msra.mxu1 %v4062_v45  ;;  %v4118_v44 = vcombine.low %v359_v33, %v363_v34  ;;  %v4125_v45 = vcombine.high %v366_v39, %v370_v40  ;;  %v4166_v33 = vcombine.low %v407_v19, %v411_v20  ;;  %v427_v39 = vld [vmem:[#allocation2 + $0xaa8] sm:$0xff] }
  0xbc   :  { %2549 = vmatprep.subr.bf16.mxu0 %v4069_v46  ;;  %2713 = vmatprep.subr.bf16.mxu1 %v4071_v50  ;;  %v4127_v46 = vcombine.high %v367_v41, %v371_v42  ;;  %v379_v50 = vld [vmem:[#allocation2 + $0x928] sm:$0xff] }
  0xbf   :  { %2550 = vmatpush1.bf16.msra.mxu0 %v4068_v52  ;;  %2714 = vmatpush1.bf16.msra.mxu1 %v4070_v53  ;;  %v4126_v52 = vcombine.low %v367_v41, %v371_v42  ;;  %v4133_v53 = vcombine.high %v374_v47, %v378_v48  ;;  %v435_v47 = vld [vmem:[#allocation2 + $0xae8] sm:$0xff] }
  0xc0   :  { %2551 = vmatprep.subr.bf16.mxu0 %v4077_v54  ;;  %2715 = vmatprep.subr.bf16.mxu1 %v4079_v59  ;;  %v4135_v54 = vcombine.high %v375_v49, %v379_v50  ;;  %v387_v59 = vld [vmem:[#allocation2 + $0x968] sm:$0xff] }
  0xc3   :  { %2552 = vmatpush1.bf16.msra.mxu0 %v4076_v61  ;;  %2716 = vmatpush1.bf16.msra.mxu1 %v4078_v62  ;;  %v4134_v61 = vcombine.low %v375_v49, %v379_v50  ;;  %v4141_v62 = vcombine.high %v382_v55, %v386_v56  ;;  %v443_v55 = vld [vmem:[#allocation2 + $0xb28] sm:$0xff] }
  0xc4   :  { %2553 = vmatprep.subr.bf16.mxu0 %v4085_v63  ;;  %2717 = vmatprep.subr.bf16.mxu1 %v4087_v3  ;;  %v4143_v63 = vcombine.high %v383_v58, %v387_v59  ;;  %v395_v3 = vld [vmem:[#allocation2 + $0x9a8] sm:$0xff] }
  0xc5   :  { %v4150_v14 = vcombine.low %v391_v2, %v395_v3 }
  0xc7   :  { %2554 = vmatpush1.bf16.msra.mxu0 %v4084_v5  ;;  %2718 = vmatpush1.bf16.msra.mxu1 %v4086_v7  ;;  %v4142_v5 = vcombine.low %v383_v58, %v387_v59  ;;  %v4151_v7 = vcombine.high %v391_v2, %v395_v3 }
  0xc8   :  { %2555 = vmatprep.subr.bf16.mxu0 %v4093_v8  ;;  %2719 = vmatprep.subr.bf16.mxu1 %v4095_v13  ;;  %v398_v8 = vld [vmem:[#allocation2 + $0x9c0] sm:$0xff]  ;;  %v4148_v13 = vcombine.low %v390_v0, %v394_v1  ;;  %v451_v0 = vld [vmem:[#allocation2 + $0xb68] sm:$0xff] }
  0xc9   :  { %v4156_v21 = vcombine.low %v398_v8, %v402_v9 }
  0xcb   :  { %2556 = vmatpush1.bf16.msra.mxu0 %v4092_v15  ;;  %2720 = vmatpush1.bf16.msra.mxu1 %v4094_v17  ;;  %v4157_v15 = vcombine.high %v398_v8, %v402_v9  ;;  %v406_v17 = vld [vmem:[#allocation2 + $0xa00] sm:$0xff]  ;;  %v459_v8 = vld [vmem:[#allocation2 + $0xba8] sm:$0xff] }
  0xcc   :  { %2566 = vmatprep.subr.bf16.mxu0 %v4101_v18  ;;  %2730 = vmatprep.subr.bf16.mxu1 %v4103_v23  ;;  %v410_v18 = vld [vmem:[#allocation2 + $0xa20] sm:$0xff]  ;;  %v4158_v23 = vcombine.low %v399_v10, %v403_v11 }
  0xcd   :  { %v4165_v24 = vcombine.high %v406_v17, %v410_v18  ;;  %v4164_v31 = vcombine.low %v406_v17, %v410_v18  ;;  %v467_v17 = vld [vmem:[#allocation2 + $0xbe8] sm:$0xff] }
  0xce   :  { %2558 = vmatmul.mubr.bf16.vlgmr.msra.gmra.mrb[0].mxu0 %v4737_v25  ;;  %2722 = vmatmul.mubr.bf16.vlgmr.msra.gmra.mrb[0].mxu1 %v4737_v25 }
  0xcf   :  { %2567 = vmatpush1.bf16.msra.mxu0 %v4100_v26  ;;  %2731 = vmatpush1.bf16.msra.mxu1 %v4102_v27  ;;  %v4167_v26 = vcombine.high %v407_v19, %v411_v20  ;;  %v414_v27 = vld [vmem:[#allocation2 + $0xa40] sm:$0xff] }
  0xd0   :  { %2568 = vmatprep.subr.bf16.mxu0 %v4109_v28  ;;  %2732 = vmatprep.subr.bf16.mxu1 %v4111_v29  ;;  %v418_v28 = vld [vmem:[#allocation2 + $0xa60] sm:$0xff]  ;;  %v415_v29 = vld [vmem:[#allocation2 + $0xa48] sm:$0xff] }
  0xd1   :  { %2598 = vmatprep.mubr.bf16.mxu0 %v4739_v32  ;;  %2762 = vmatprep.mubr.bf16.mxu1 %v4739_v32  ;;  %v4173_v34 = vcombine.high %v414_v27, %v418_v28  ;;  %v4172_v40 = vcombine.low %v414_v27, %v418_v28  ;;  %v4174_v41 = vcombine.low %v415_v29, %v419_v30  ;;  %v475_v27 = vld [vmem:[#allocation2 + $0xc28] sm:$0xff] }
  0xd3   :  { %2569 = vmatpush1.bf16.msra.mxu0 %v4108_v35  ;;  %2733 = vmatpush1.bf16.msra.mxu1 %v4110_v36  ;;  %v4175_v35 = vcombine.high %v415_v29, %v419_v30  ;;  %v422_v36 = vld [vmem:[#allocation2 + $0xa80] sm:$0xff] }
  0xd4   :  { %2570 = vmatprep.subr.bf16.mxu0 %v4117_v37  ;;  %2734 = vmatprep.subr.bf16.mxu1 %v4119_v38  ;;  %v426_v37 = vld [vmem:[#allocation2 + $0xaa0] sm:$0xff]  ;;  %v423_v38 = vld [vmem:[#allocation2 + $0xa88] sm:$0xff] }
  0xd5   :  { %v4181_v42 = vcombine.high %v422_v36, %v426_v37  ;;  %v4180_v48 = vcombine.low %v422_v36, %v426_v37  ;;  %v4182_v49 = vcombine.low %v423_v38, %v427_v39  ;;  %v76_v29 = vld [vmem:[%s4804_s0 + $0x20] sm:$0xff]  ;;  %v92_v36 = vld [vmem:[#allocation2 + $0x30] sm:$0xff] }
  0xd7   :  { %2571 = vmatpush1.bf16.msra.mxu0 %v4116_v43  ;;  %2735 = vmatpush1.bf16.msra.mxu1 %v4118_v44  ;;  %v4183_v43 = vcombine.high %v423_v38, %v427_v39  ;;  %v430_v44 = vld [vmem:[#allocation2 + $0xac0] sm:$0xff]  ;;  %v89_v38 = vld [vmem:[#allocation2 + $0x18] sm:$0xff] }
  0xd8   :  { %2572 = vmatprep.subr.bf16.mxu0 %v4125_v45  ;;  %2736 = vmatprep.subr.bf16.mxu1 %v4127_v46  ;;  %v434_v45 = vld [vmem:[#allocation2 + $0xae0] sm:$0xff]  ;;  %v431_v46 = vld [vmem:[#allocation2 + $0xac8] sm:$0xff]  ;;  %v93_v39 = vld [vmem:[#allocation2 + $0x38] sm:$0xff] }
  0xd9   :  { %v4189_v50 = vcombine.high %v430_v44, %v434_v45  ;;  %v4188_v56 = vcombine.low %v430_v44, %v434_v45  ;;  %v4190_v58 = vcombine.low %v431_v46, %v435_v47  ;;  %v78_v44 = vld [vmem:[%s4804_s0 + $0x30] sm:$0xff] }
  0xda   :  { %v96_v45 = vld [vmem:[#allocation2 + $0x50] sm:$0xff] }
  0xdb   :  { %2573 = vmatpush1.bf16.msra.mxu0 %v4124_v51  ;;  %2737 = vmatpush1.bf16.msra.mxu1 %v4126_v52  ;;  %v4191_v51 = vcombine.high %v431_v46, %v435_v47  ;;  %v438_v52 = vld [vmem:[#allocation2 + $0xb00] sm:$0xff]  ;;  %v100_v46 = vld [vmem:[#allocation2 + $0x70] sm:$0xff]  ;;  %v4757_v47 = vpack.c.bf16 %v78_v44, %v78_v44 }
  0xdc   :  { %2574 = vmatprep.subr.bf16.mxu0 %v4133_v53  ;;  %2738 = vmatprep.subr.bf16.mxu1 %v4135_v54  ;;  %v442_v53 = vld [vmem:[#allocation2 + $0xb20] sm:$0xff]  ;;  %v439_v54 = vld [vmem:[#allocation2 + $0xb08] sm:$0xff]  ;;  %v152_v44 = vld [vmem:[#allocation2 + $0x210] sm:$0xff] }
  0xdd   :  { %v4197_v59 = vcombine.high %v438_v52, %v442_v53  ;;  %v4196_v1 = vcombine.low %v438_v52, %v442_v53  ;;  %v4198_v2 = vcombine.low %v439_v54, %v443_v55  ;;  %v3857_v52 = vcombine.high %v96_v45, %v100_v46 }
  0xdf   :  { %2575 = vmatpush1.bf16.msra.mxu0 %v4132_v60  ;;  %2739 = vmatpush1.bf16.msra.mxu1 %v4134_v61  ;;  %v4199_v60 = vcombine.high %v439_v54, %v443_v55  ;;  %v446_v61 = vld [vmem:[#allocation2 + $0xb40] sm:$0xff]  ;;  %v104_v54 = vld [vmem:[#allocation2 + $0x90] sm:$0xff] }
  0xe0   :  { %2576 = vmatprep.subr.bf16.mxu0 %v4141_v62  ;;  %2740 = vmatprep.subr.bf16.mxu1 %v4143_v63  ;;  %v450_v62 = vld [vmem:[#allocation2 + $0xb60] sm:$0xff]  ;;  %v447_v63 = vld [vmem:[#allocation2 + $0xb48] sm:$0xff]  ;;  %v108_v55 = vld [vmem:[#allocation2 + $0xb0] sm:$0xff] }
  0xe1   :  { %v4205_v3 = vcombine.high %v446_v61, %v450_v62  ;;  %v4204_v9 = vcombine.low %v446_v61, %v450_v62  ;;  %v4206_v10 = vcombine.low %v447_v63, %v451_v0  ;;  %v3865_v61 = vcombine.high %v104_v54, %v108_v55 }
  0xe3   :  { %2577 = vmatpush1.bf16.msra.mxu0 %v4140_v4  ;;  %2741 = vmatpush1.bf16.msra.mxu1 %v4142_v5  ;;  %v4207_v4 = vcombine.high %v447_v63, %v451_v0  ;;  %v454_v5 = vld [vmem:[#allocation2 + $0xb80] sm:$0xff]  ;;  %v112_v63 = vld [vmem:[#allocation2 + $0xd0] sm:$0xff] }
  0xe4   :  { %2578 = vmatprep.subr.bf16.mxu0 %v4149_v6  ;;  %2742 = vmatprep.subr.bf16.mxu1 %v4151_v7  ;;  %v458_v6 = vld [vmem:[#allocation2 + $0xba0] sm:$0xff]  ;;  %v455_v7 = vld [vmem:[#allocation2 + $0xb88] sm:$0xff]  ;;  %v116_v0 = vld [vmem:[#allocation2 + $0xf0] sm:$0xff] }
  0xe5   :  { %v4213_v11 = vcombine.high %v454_v5, %v458_v6  ;;  %v4212_v18 = vcombine.low %v454_v5, %v458_v6  ;;  %v4214_v19 = vcombine.low %v455_v7, %v459_v8  ;;  %v3873_v5 = vcombine.high %v112_v63, %v116_v0 }
  0xe7   :  { %2579 = vmatpush1.bf16.msra.mxu0 %v4148_v13  ;;  %2743 = vmatpush1.bf16.msra.mxu1 %v4150_v14  ;;  %v4215_v13 = vcombine.high %v455_v7, %v459_v8  ;;  %v462_v14 = vld [vmem:[#allocation2 + $0xbc0] sm:$0xff]  ;;  %v120_v7 = vld [vmem:[#allocation2 + $0x110] sm:$0xff] }
  0xe8   :  { %2580 = vmatprep.subr.bf16.mxu0 %v4157_v15  ;;  %2744 = vmatprep.subr.bf16.mxu1 %v4159_v16  ;;  %v466_v15 = vld [vmem:[#allocation2 + $0xbe0] sm:$0xff]  ;;  %v463_v16 = vld [vmem:[#allocation2 + $0xbc8] sm:$0xff]  ;;  %v124_v8 = vld [vmem:[#allocation2 + $0x130] sm:$0xff] }
  0xe9   :  { %v4221_v20 = vcombine.high %v462_v14, %v466_v15  ;;  %v4220_v28 = vcombine.low %v462_v14, %v466_v15  ;;  %v4222_v30 = vcombine.low %v463_v16, %v467_v17  ;;  %v3881_v14 = vcombine.high %v120_v7, %v124_v8  ;;  %v128_v15 = vld [vmem:[#allocation2 + $0x150] sm:$0xff] }
  0xeb   :  { %2581 = vmatpush1.bf16.msra.mxu0 %v4156_v21  ;;  %2745 = vmatpush1.bf16.msra.mxu1 %v4158_v23  ;;  %v4223_v21 = vcombine.high %v463_v16, %v467_v17  ;;  %v470_v23 = vld [vmem:[#allocation2 + $0xc00] sm:$0xff]  ;;  %v132_v16 = vld [vmem:[#allocation2 + $0x170] sm:$0xff]  ;;  %v129_v17 = vld [vmem:[#allocation2 + $0x158] sm:$0xff] }
  0xec   :  { %2582 = vmatprep.subr.bf16.mxu0 %v4165_v24  ;;  %2746 = vmatprep.subr.bf16.mxu1 %v4167_v26  ;;  %v474_v24 = vld [vmem:[#allocation2 + $0xc20] sm:$0xff]  ;;  %v471_v26 = vld [vmem:[#allocation2 + $0xc08] sm:$0xff] }
  0xed   :  { %v4228_v37 = vcombine.low %v470_v23, %v474_v24 }
  0xef   :  { %2583 = vmatpush1.bf16.msra.mxu0 %v4164_v31  ;;  %2747 = vmatpush1.bf16.msra.mxu1 %v4166_v33  ;;  %v4229_v31 = vcombine.high %v470_v23, %v474_v24  ;;  %v4231_v33 = vcombine.high %v471_v26, %v475_v27  ;;  %v136_v24 = vld [vmem:[#allocation2 + $0x190] sm:$0xff] }
  0xf0   :  { %2584 = vmatprep.subr.bf16.mxu0 %v4173_v34  ;;  %2748 = vmatprep.subr.bf16.mxu1 %v4175_v35  ;;  %v4748_v34 = vpack.c.bf16 %v76_v29, %v76_v29  ;;  %v88_v35 = vld [vmem:[#allocation2 + $0x10] sm:$0xff]  ;;  %v3888_v29 = vcombine.low %v128_v15, %v132_v16 }
  0xf3   :  { %2585 = vmatpush1.bf16.msra.mxu0 %v4172_v40  ;;  %2749 = vmatpush1.bf16.msra.mxu1 %v4174_v41  ;;  %v4230_v40 = vcombine.low %v471_v26, %v475_v27  ;;  %v3849_v41 = vcombine.high %v88_v35, %v92_v36  ;;  %v140_v26 = vld [vmem:[#allocation2 + $0x1b0] sm:$0xff]  ;;  %v137_v27 = vld [vmem:[#allocation2 + $0x198] sm:$0xff] }
  0xf4   :  { %2586 = vmatprep.subr.bf16.mxu0 %v4181_v42  ;;  %2750 = vmatprep.subr.bf16.mxu1 %v4183_v43  ;;  %v3851_v42 = vcombine.high %v89_v38, %v93_v39  ;;  %v4624_v43 = vmov 0  }
  0xf7   :  { %2587 = vmatpush1.bf16.msra.mxu0 %v4180_v48  ;;  %2751 = vmatpush1.bf16.msra.mxu1 %v4182_v49  ;;  %v97_v48 = vld [vmem:[#allocation2 + $0x58] sm:$0xff] }
  0xf8   :  { %2588 = vmatprep.subr.bf16.mxu0 %v4189_v50  ;;  %2752 = vmatprep.subr.bf16.mxu1 %v4191_v51  ;;  %v101_v49 = vld [vmem:[#allocation2 + $0x78] sm:$0xff]  ;;  %v3848_v50 = vcombine.low %v88_v35, %v92_v36  ;;  %v3850_v51 = vcombine.low %v89_v38, %v93_v39  ;;  %v144_v35 = vld [vmem:[#allocation2 + $0x1d0] sm:$0xff]  ;;  %v3896_v39 = vcombine.low %v136_v24, %v140_v26 }
  0xf9   :  { %v3859_v53 = vcombine.high %v97_v48, %v101_v49  ;;  %v148_v36 = vld [vmem:[#allocation2 + $0x1f0] sm:$0xff]  ;;  %v149_v38 = vld [vmem:[#allocation2 + $0x1f8] sm:$0xff] }
  0xfb   :  { %2589 = vmatpush1.bf16.msra.mxu0 %v4188_v56  ;;  %2753 = vmatpush1.bf16.msra.mxu1 %v4190_v58  ;;  %v105_v56 = vld [vmem:[#allocation2 + $0x98] sm:$0xff] }
  0xfc   :  { %2590 = vmatprep.subr.bf16.mxu0 %v4197_v59  ;;  %2754 = vmatprep.subr.bf16.mxu1 %v4199_v60  ;;  %v109_v58 = vld [vmem:[#allocation2 + $0xb8] sm:$0xff]  ;;  %v3856_v59 = vcombine.low %v96_v45, %v100_v46  ;;  %v3858_v60 = vcombine.low %v97_v48, %v101_v49  ;;  %v156_v45 = vld [vmem:[#allocation2 + $0x230] sm:$0xff]  ;;  %v3904_v49 = vcombine.low %v144_v35, %v148_v36 }
  0xfd   :  { %v3867_v62 = vcombine.high %v105_v56, %v109_v58  ;;  %v153_v46 = vld [vmem:[#allocation2 + $0x218] sm:$0xff] }
  0xfe   :  { %v157_v48 = vld [vmem:[#allocation2 + $0x238] sm:$0xff] }
  0xff   :  { %2591 = vmatpush1.bf16.msra.mxu0 %v4196_v1  ;;  %2755 = vmatpush1.bf16.msra.mxu1 %v4198_v2  ;;  %v113_v1 = vld [vmem:[#allocation2 + $0xd8] sm:$0xff] }
 0x100   :  { %2592 = vmatprep.subr.bf16.mxu0 %v4205_v3  ;;  %2756 = vmatprep.subr.bf16.mxu1 %v4207_v4  ;;  %v117_v2 = vld [vmem:[#allocation2 + $0xf8] sm:$0xff]  ;;  %v3864_v3 = vcombine.low %v104_v54, %v108_v55  ;;  %v3866_v4 = vcombine.low %v105_v56, %v109_v58  ;;  %v164_v54 = vld [vmem:[#allocation2 + $0x270] sm:$0xff]  ;;  %v3912_v58 = vcombine.low %v152_v44, %v156_v45 }
 0x101   :  { %v3875_v6 = vcombine.high %v113_v1, %v117_v2  ;;  %v161_v55 = vld [vmem:[#allocation2 + $0x258] sm:$0xff] }
 0x102   :  { %v165_v56 = vld [vmem:[#allocation2 + $0x278] sm:$0xff] }
 0x103   :  { %2593 = vmatpush1.bf16.msra.mxu0 %v4204_v9  ;;  %2757 = vmatpush1.bf16.msra.mxu1 %v4206_v10  ;;  %v121_v9 = vld [vmem:[#allocation2 + $0x118] sm:$0xff] }
 0x104   :  { %2594 = vmatprep.subr.bf16.mxu0 %v4213_v11  ;;  %2758 = vmatprep.subr.bf16.mxu1 %v4215_v13  ;;  %v125_v10 = vld [vmem:[#allocation2 + $0x138] sm:$0xff]  ;;  %v3872_v11 = vcombine.low %v112_v63, %v116_v0  ;;  %v3874_v13 = vcombine.low %v113_v1, %v117_v2  ;;  %v172_v63 = vld [vmem:[#allocation2 + $0x2b0] sm:$0xff] }
 0x105   :  { %v169_v0 = vld [vmem:[#allocation2 + $0x298] sm:$0xff] }
 0x106   :  { %v173_v1 = vld [vmem:[#allocation2 + $0x2b8] sm:$0xff] }
 0x107   :  { %2595 = vmatpush1.bf16.msra.mxu0 %v4212_v18  ;;  %2759 = vmatpush1.bf16.msra.mxu1 %v4214_v19  ;;  %v133_v18 = vld [vmem:[#allocation2 + $0x178] sm:$0xff]  ;;  %v3880_v19 = vcombine.low %v120_v7, %v124_v8  ;;  %v180_v7 = vld [vmem:[#allocation2 + $0x2f0] sm:$0xff] }
 0x108   :  { %2596 = vmatprep.subr.bf16.mxu0 %v4221_v20  ;;  %2760 = vmatprep.subr.bf16.mxu1 %v4223_v21  ;;  %v3882_v20 = vcombine.low %v121_v9, %v125_v10  ;;  %v3889_v21 = vcombine.high %v128_v15, %v132_v16  ;;  %v3891_v23 = vcombine.high %v129_v17, %v133_v18  ;;  %v177_v8 = vld [vmem:[#allocation2 + $0x2d8] sm:$0xff]  ;;  %v188_v15 = vld [vmem:[#allocation2 + $0x330] sm:$0xff] }
 0x109   :  { %v185_v16 = vld [vmem:[#allocation2 + $0x318] sm:$0xff] }
 0x10b   :  { %2597 = vmatpush1.bf16.msra.mxu0 %v4220_v28  ;;  %2761 = vmatpush1.bf16.msra.mxu1 %v4222_v30  ;;  %v141_v28 = vld [vmem:[#allocation2 + $0x1b8] sm:$0xff]  ;;  %v3890_v30 = vcombine.low %v129_v17, %v133_v18 }
 0x10c   :  { %2607 = vmatprep.subr.bf16.mxu0 %v4229_v31  ;;  %2771 = vmatprep.subr.bf16.mxu1 %v4231_v33  ;;  %v3897_v31 = vcombine.high %v136_v24, %v140_v26  ;;  %v3899_v33 = vcombine.high %v137_v27, %v141_v28  ;;  %v189_v17 = vld [vmem:[#allocation2 + $0x338] sm:$0xff]  ;;  %v196_v24 = vld [vmem:[#allocation2 + $0x370] sm:$0xff] }
 0x10d   :  { %v193_v26 = vld [vmem:[#allocation2 + $0x358] sm:$0xff] }
 0x10e   :  { %2599 = vmatmul.mubr.bf16.vlgmr.msra.gmra.mrb[0].mxu0 %v4748_v34  ;;  %2763 = vmatmul.mubr.bf16.vlgmr.msra.gmra.mrb[0].mxu1 %v4748_v34 }
 0x10f   :  { %2608 = vmatpush1.bf16.msra.mxu0 %v4228_v37  ;;  %2772 = vmatpush1.bf16.msra.mxu1 %v4230_v40  ;;  %v145_v37 = vld [vmem:[#allocation2 + $0x1d8] sm:$0xff]  ;;  %v3898_v40 = vcombine.low %v137_v27, %v141_v28 }
 0x110   :  { %2639 = vmatprep.mubr.bf16.mxu0 %v4624_v43  ;;  %2803 = vmatprep.mubr.bf16.mxu1 %v4624_v43  ;;  %v197_v27 = vld [vmem:[#allocation2 + $0x378] sm:$0xff] }
 0x111   :  { %2812 = vmatprep.subr.bf16.mxu0 %v3849_v41  ;;  %2976 = vmatprep.subr.bf16.mxu1 %v3851_v42  ;;  %v3905_v41 = vcombine.high %v144_v35, %v148_v36  ;;  %v3907_v42 = vcombine.high %v145_v37, %v149_v38  ;;  %v204_v35 = vld [vmem:[#allocation2 + $0x3b0] sm:$0xff]  ;;  %v201_v36 = vld [vmem:[#allocation2 + $0x398] sm:$0xff] }
 0x11a   :  { %4236 = vmatmul.mubr.msk.bf16.vlgmr.msra.gmra.mrb[0].mxu0 %vm2480_vm0, %v4757_v47  ;;  %4237 = vmatmul.mubr.msk.bf16.vlgmr.msra.gmra.mrb[0].mxu1 %vm2480_vm0, %v4757_v47 }
 0x11b   :  { %2813 = vmatpush1.bf16.msra.mxu0 %v3848_v50  ;;  %2977 = vmatpush1.bf16.msra.mxu1 %v3850_v51  ;;  %v3906_v50 = vcombine.low %v145_v37, %v149_v38  ;;  %v3913_v51 = vcombine.high %v152_v44, %v156_v45  ;;  %v205_v37 = vld [vmem:[#allocation2 + $0x3b8] sm:$0xff]  ;;  %v212_v44 = vld [vmem:[#allocation2 + $0x3f0] sm:$0xff] }
 0x11c   :  { %2814 = vmatprep.subr.bf16.mxu0 %v3857_v52  ;;  %2978 = vmatprep.subr.bf16.mxu1 %v3859_v53  ;;  %v3915_v52 = vcombine.high %v153_v46, %v157_v48  ;;  %v160_v53 = vld [vmem:[#allocation2 + $0x250] sm:$0xff]  ;;  %v209_v45 = vld [vmem:[#allocation2 + $0x3d8] sm:$0xff] }
 0x11d   :  { %2844 = vmatprep.mubr.bf16.mxu0 %v4713_v57  ;;  %3008 = vmatprep.mubr.bf16.mxu1 %v4713_v57  ;;  %v3883_v57 = vcombine.high %v121_v9, %v125_v10  ;;  %v3920_v2 = vcombine.low %v160_v53, %v164_v54  ;;  %v181_v9 = vld [vmem:[#allocation2 + $0x2f8] sm:$0xff] }
 0x11f   :  { %2815 = vmatpush1.bf16.msra.mxu0 %v3856_v59  ;;  %2979 = vmatpush1.bf16.msra.mxu1 %v3858_v60  ;;  %v3914_v59 = vcombine.low %v153_v46, %v157_v48  ;;  %v3921_v60 = vcombine.high %v160_v53, %v164_v54  ;;  %v213_v46 = vld [vmem:[#allocation2 + $0x3f8] sm:$0xff]  ;;  %v220_v53 = vld [vmem:[#allocation2 + $0x430] sm:$0xff] }
 0x120   :  { %2816 = vmatprep.subr.bf16.mxu0 %v3865_v61  ;;  %2980 = vmatprep.subr.bf16.mxu1 %v3867_v62  ;;  %v3923_v61 = vcombine.high %v161_v55, %v165_v56  ;;  %v168_v62 = vld [vmem:[#allocation2 + $0x290] sm:$0xff]  ;;  %v217_v54 = vld [vmem:[#allocation2 + $0x418] sm:$0xff] }
 0x121   :  { %v3928_v10 = vcombine.low %v168_v62, %v172_v63 }
 0x123   :  { %2817 = vmatpush1.bf16.msra.mxu0 %v3864_v3  ;;  %2981 = vmatpush1.bf16.msra.mxu1 %v3866_v4  ;;  %v3922_v3 = vcombine.low %v161_v55, %v165_v56  ;;  %v3929_v4 = vcombine.high %v168_v62, %v172_v63  ;;  %v221_v55 = vld [vmem:[#allocation2 + $0x438] sm:$0xff]  ;;  %v228_v62 = vld [vmem:[#allocation2 + $0x470] sm:$0xff] }
 0x124   :  { %2818 = vmatprep.subr.bf16.mxu0 %v3873_v5  ;;  %2982 = vmatprep.subr.bf16.mxu1 %v3875_v6  ;;  %v3931_v5 = vcombine.high %v169_v0, %v173_v1  ;;  %v176_v6 = vld [vmem:[#allocation2 + $0x2d0] sm:$0xff]  ;;  %v225_v63 = vld [vmem:[#allocation2 + $0x458] sm:$0xff] }
 0x125   :  { %v3936_v18 = vcombine.low %v176_v6, %v180_v7 }
 0x127   :  { %2819 = vmatpush1.bf16.msra.mxu0 %v3872_v11  ;;  %2983 = vmatpush1.bf16.msra.mxu1 %v3874_v13  ;;  %v3930_v11 = vcombine.low %v169_v0, %v173_v1  ;;  %v3937_v13 = vcombine.high %v176_v6, %v180_v7  ;;  %v229_v0 = vld [vmem:[#allocation2 + $0x478] sm:$0xff]  ;;  %v236_v6 = vld [vmem:[#allocation2 + $0x4b0] sm:$0xff] }
 0x128   :  { %2820 = vmatprep.subr.bf16.mxu0 %v3881_v14  ;;  %2984 = vmatprep.subr.bf16.mxu1 %v3883_v57  ;;  %v3939_v14 = vcombine.high %v177_v8, %v181_v9  ;;  %v184_v57 = vld [vmem:[#allocation2 + $0x310] sm:$0xff]  ;;  %v233_v7 = vld [vmem:[#allocation2 + $0x498] sm:$0xff] }
 0x129   :  { %v3944_v28 = vcombine.low %v184_v57, %v188_v15 }
 0x12b   :  { %2821 = vmatpush1.bf16.msra.mxu0 %v3880_v19  ;;  %2985 = vmatpush1.bf16.msra.mxu1 %v3882_v20  ;;  %v3938_v19 = vcombine.low %v177_v8, %v181_v9  ;;  %v3945_v20 = vcombine.high %v184_v57, %v188_v15  ;;  %v237_v8 = vld [vmem:[#allocation2 + $0x4b8] sm:$0xff]  ;;  %v244_v57 = vld [vmem:[#allocation2 + $0x4f0] sm:$0xff] }
 0x12c   :  { %2822 = vmatprep.subr.bf16.mxu0 %v3889_v21  ;;  %2986 = vmatprep.subr.bf16.mxu1 %v3891_v23  ;;  %v3947_v21 = vcombine.high %v185_v16, %v189_v17  ;;  %v192_v23 = vld [vmem:[#allocation2 + $0x350] sm:$0xff]  ;;  %v241_v15 = vld [vmem:[#allocation2 + $0x4d8] sm:$0xff] }
 0x12d   :  { %v3952_v38 = vcombine.low %v192_v23, %v196_v24 }
 0x12f   :  { %2823 = vmatpush1.bf16.msra.mxu0 %v3888_v29  ;;  %2987 = vmatpush1.bf16.msra.mxu1 %v3890_v30  ;;  %v3946_v29 = vcombine.low %v185_v16, %v189_v17  ;;  %v3953_v30 = vcombine.high %v192_v23, %v196_v24  ;;  %v245_v16 = vld [vmem:[#allocation2 + $0x4f8] sm:$0xff] }
 0x130   :  { %2824 = vmatprep.subr.bf16.mxu0 %v3897_v31  ;;  %2988 = vmatprep.subr.bf16.mxu1 %v3899_v33  ;;  %v3955_v31 = vcombine.high %v193_v26, %v197_v27  ;;  %v200_v33 = vld [vmem:[#allocation2 + $0x390] sm:$0xff]  ;;  %v249_v23 = vld [vmem:[#allocation2 + $0x518] sm:$0xff] }
 0x131   :  { %v3960_v48 = vcombine.low %v200_v33, %v204_v35  ;;  %v253_v24 = vld [vmem:[#allocation2 + $0x538] sm:$0xff] }
 0x133   :  { %2825 = vmatpush1.bf16.msra.mxu0 %v3896_v39  ;;  %2989 = vmatpush1.bf16.msra.mxu1 %v3898_v40  ;;  %v3954_v39 = vcombine.low %v193_v26, %v197_v27  ;;  %v3961_v40 = vcombine.high %v200_v33, %v204_v35  ;;  %v4002_v27 = vcombine.low %v241_v15, %v245_v16  ;;  %v261_v33 = vld [vmem:[#allocation2 + $0x578] sm:$0xff] }
 0x134   :  { %2826 = vmatprep.subr.bf16.mxu0 %v3905_v41  ;;  %2990 = vmatprep.subr.bf16.mxu1 %v3907_v42  ;;  %v3963_v41 = vcombine.high %v201_v36, %v205_v37  ;;  %v208_v42 = vld [vmem:[#allocation2 + $0x3d0] sm:$0xff] }
 0x135   :  { %v3968_v56 = vcombine.low %v208_v42, %v212_v44 }
 0x137   :  { %2827 = vmatpush1.bf16.msra.mxu0 %v3904_v49  ;;  %2991 = vmatpush1.bf16.msra.mxu1 %v3906_v50  ;;  %v3962_v49 = vcombine.low %v201_v36, %v205_v37  ;;  %v3969_v50 = vcombine.high %v208_v42, %v212_v44  ;;  %v4010_v36 = vcombine.low %v249_v23, %v253_v24  ;;  %v269_v42 = vld [vmem:[#allocation2 + $0x5b8] sm:$0xff] }
 0x138   :  { %2828 = vmatprep.subr.bf16.mxu0 %v3913_v51  ;;  %2992 = vmatprep.subr.bf16.mxu1 %v3915_v52  ;;  %v3971_v51 = vcombine.high %v209_v45, %v213_v46  ;;  %v216_v52 = vld [vmem:[#allocation2 + $0x410] sm:$0xff] }
 0x139   :  { %v3976_v1 = vcombine.low %v216_v52, %v220_v53 }
 0x13b   :  { %2829 = vmatpush1.bf16.msra.mxu0 %v3912_v58  ;;  %2993 = vmatpush1.bf16.msra.mxu1 %v3914_v59  ;;  %v3970_v58 = vcombine.low %v209_v45, %v213_v46  ;;  %v3977_v59 = vcombine.high %v216_v52, %v220_v53  ;;  %v277_v52 = vld [vmem:[#allocation2 + $0x5f8] sm:$0xff] }
 0x13c   :  { %2830 = vmatprep.subr.bf16.mxu0 %v3921_v60  ;;  %2994 = vmatprep.subr.bf16.mxu1 %v3923_v61  ;;  %v3979_v60 = vcombine.high %v217_v54, %v221_v55  ;;  %v224_v61 = vld [vmem:[#allocation2 + $0x450] sm:$0xff] }
 0x13d   :  { %v3984_v9 = vcombine.low %v224_v61, %v228_v62 }
 0x13f   :  { %2831 = vmatpush1.bf16.msra.mxu0 %v3920_v2  ;;  %2995 = vmatpush1.bf16.msra.mxu1 %v3922_v3  ;;  %v3978_v2 = vcombine.low %v217_v54, %v221_v55  ;;  %v3985_v3 = vcombine.high %v224_v61, %v228_v62  ;;  %v285_v61 = vld [vmem:[#allocation2 + $0x638] sm:$0xff] }
 0x140   :  { %2832 = vmatprep.subr.bf16.mxu0 %v3929_v4  ;;  %2996 = vmatprep.subr.bf16.mxu1 %v3931_v5  ;;  %v3987_v4 = vcombine.high %v225_v63, %v229_v0  ;;  %v232_v5 = vld [vmem:[#allocation2 + $0x490] sm:$0xff] }
 0x141   :  { %v3992_v17 = vcombine.low %v232_v5, %v236_v6 }
 0x143   :  { %2833 = vmatpush1.bf16.msra.mxu0 %v3928_v10  ;;  %2997 = vmatpush1.bf16.msra.mxu1 %v3930_v11  ;;  %v3986_v10 = vcombine.low %v225_v63, %v229_v0  ;;  %v3993_v11 = vcombine.high %v232_v5, %v236_v6  ;;  %v293_v5 = vld [vmem:[#allocation2 + $0x678] sm:$0xff] }
 0x144   :  { %2834 = vmatprep.subr.bf16.mxu0 %v3937_v13  ;;  %2998 = vmatprep.subr.bf16.mxu1 %v3939_v14  ;;  %v3995_v13 = vcombine.high %v233_v7, %v237_v8  ;;  %v240_v14 = vld [vmem:[#allocation2 + $0x4d0] sm:$0xff] }
 0x145   :  { %v4000_v26 = vcombine.low %v240_v14, %v244_v57 }
 0x147   :  { %2835 = vmatpush1.bf16.msra.mxu0 %v3936_v18  ;;  %2999 = vmatpush1.bf16.msra.mxu1 %v3938_v19  ;;  %v4001_v18 = vcombine.high %v240_v14, %v244_v57  ;;  %v4003_v19 = vcombine.high %v241_v15, %v245_v16  ;;  %v301_v14 = vld [vmem:[#allocation2 + $0x6b8] sm:$0xff] }
 0x148   :  { %2836 = vmatprep.subr.bf16.mxu0 %v3945_v20  ;;  %3000 = vmatprep.subr.bf16.mxu1 %v3947_v21  ;;  %v248_v20 = vld [vmem:[#allocation2 + $0x510] sm:$0xff] }
 0x149   :  { %v252_v21 = vld [vmem:[#allocation2 + $0x530] sm:$0xff] }
 0x14a   :  { %v4008_v35 = vcombine.low %v248_v20, %v252_v21 }
 0x14b   :  { %2837 = vmatpush1.bf16.msra.mxu0 %v3944_v28  ;;  %3001 = vmatpush1.bf16.msra.mxu1 %v3946_v29  ;;  %v4009_v28 = vcombine.high %v248_v20, %v252_v21  ;;  %v256_v29 = vld [vmem:[#allocation2 + $0x550] sm:$0xff]  ;;  %v309_v20 = vld [vmem:[#allocation2 + $0x6f8] sm:$0xff] }
 0x14c   :  { %2838 = vmatprep.subr.bf16.mxu0 %v3953_v30  ;;  %3002 = vmatprep.subr.bf16.mxu1 %v3955_v31  ;;  %v260_v30 = vld [vmem:[#allocation2 + $0x570] sm:$0xff]  ;;  %v257_v31 = vld [vmem:[#allocation2 + $0x558] sm:$0xff] }
 0x14d   :  { %v4017_v37 = vcombine.high %v256_v29, %v260_v30  ;;  %v4016_v44 = vcombine.low %v256_v29, %v260_v30  ;;  %v4018_v45 = vcombine.low %v257_v31, %v261_v33  ;;  %v317_v29 = vld [vmem:[#allocation2 + $0x738] sm:$0xff] }
 0x14f   :  { %2839 = vmatpush1.bf16.msra.mxu0 %v3952_v38  ;;  %3003 = vmatpush1.bf16.msra.mxu1 %v3954_v39  ;;  %v4019_v38 = vcombine.high %v257_v31, %v261_v33  ;;  %v264_v39 = vld [vmem:[#allocation2 + $0x590] sm:$0xff] }
 0x150   :  { %2840 = vmatprep.subr.bf16.mxu0 %v3961_v40  ;;  %3004 = vmatprep.subr.bf16.mxu1 %v3963_v41  ;;  %v268_v40 = vld [vmem:[#allocation2 + $0x5b0] sm:$0xff]  ;;  %v265_v41 = vld [vmem:[#allocation2 + $0x598] sm:$0xff] }
 0x151   :  { %v4025_v46 = vcombine.high %v264_v39, %v268_v40  ;;  %v4024_v53 = vcombine.low %v264_v39, %v268_v40  ;;  %v4026_v54 = vcombine.low %v265_v41, %v269_v42  ;;  %v325_v39 = vld [vmem:[#allocation2 + $0x778] sm:$0xff] }
 0x153   :  { %2841 = vmatpush1.bf16.msra.mxu0 %v3960_v48  ;;  %3005 = vmatpush1.bf16.msra.mxu1 %v3962_v49  ;;  %v4027_v48 = vcombine.high %v265_v41, %v269_v42  ;;  %v272_v49 = vld [vmem:[#allocation2 + $0x5d0] sm:$0xff] }
 0x154   :  { %2842 = vmatprep.subr.bf16.mxu0 %v3969_v50  ;;  %3006 = vmatprep.subr.bf16.mxu1 %v3971_v51  ;;  %v276_v50 = vld [vmem:[#allocation2 + $0x5f0] sm:$0xff]  ;;  %v273_v51 = vld [vmem:[#allocation2 + $0x5d8] sm:$0xff] }
 0x155   :  { %v4033_v55 = vcombine.high %v272_v49, %v276_v50  ;;  %v4032_v62 = vcombine.low %v272_v49, %v276_v50  ;;  %v4034_v63 = vcombine.low %v273_v51, %v277_v52  ;;  %v333_v49 = vld [vmem:[#allocation2 + $0x7b8] sm:$0xff] }
 0x157   :  { %2843 = vmatpush1.bf16.msra.mxu0 %v3968_v56  ;;  %3007 = vmatpush1.bf16.msra.mxu1 %v3970_v58  ;;  %v4035_v56 = vcombine.high %v273_v51, %v277_v52  ;;  %v280_v58 = vld [vmem:[#allocation2 + $0x610] sm:$0xff] }
 0x158   :  { %2853 = vmatprep.subr.bf16.mxu0 %v3977_v59  ;;  %3017 = vmatprep.subr.bf16.mxu1 %v3979_v60  ;;  %v284_v59 = vld [vmem:[#allocation2 + $0x630] sm:$0xff]  ;;  %v281_v60 = vld [vmem:[#allocation2 + $0x618] sm:$0xff] }
 0x159   :  { %v4041_v0 = vcombine.high %v280_v58, %v284_v59  ;;  %v4040_v6 = vcombine.low %v280_v58, %v284_v59  ;;  %v341_v58 = vld [vmem:[#allocation2 + $0x7f8] sm:$0xff] }
 0x15a   :  { %2845 = vmatmul.mubr.bf16.vlgmr.msra.gmra.mrb[4].mxu0 %v4720_v12  ;;  %3009 = vmatmul.mubr.bf16.vlgmr.msra.gmra.mrb[4].mxu1 %v4720_v12  ;;  %v3994_v12 = vcombine.low %v233_v7, %v237_v8  ;;  %v4042_v7 = vcombine.low %v281_v60, %v285_v61 }
 0x15b   :  { %2854 = vmatpush1.bf16.msra.mxu0 %v3976_v1  ;;  %3018 = vmatpush1.bf16.msra.mxu1 %v3978_v2  ;;  %v4043_v1 = vcombine.high %v281_v60, %v285_v61  ;;  %v288_v2 = vld [vmem:[#allocation2 + $0x650] sm:$0xff] }
 0x15c   :  { %2855 = vmatprep.subr.bf16.mxu0 %v3985_v3  ;;  %3019 = vmatprep.subr.bf16.mxu1 %v3987_v4  ;;  %v292_v3 = vld [vmem:[#allocation2 + $0x670] sm:$0xff]  ;;  %v289_v4 = vld [vmem:[#allocation2 + $0x658] sm:$0xff] }
 0x15d   :  { %2885 = vmatprep.mubr.bf16.mxu0 %v4725_v22  ;;  %3049 = vmatprep.mubr.bf16.mxu1 %v4725_v22  ;;  %v4011_v22 = vcombine.high %v249_v23, %v253_v24  ;;  %v4049_v8 = vcombine.high %v288_v2, %v292_v3  ;;  %v4048_v57 = vcombine.low %v288_v2, %v292_v3  ;;  %v349_v2 = vld [vmem:[#allocation2 + $0x838] sm:$0xff] }
 0x15e   :  { %v4050_v15 = vcombine.low %v289_v4, %v293_v5 }
 0x15f   :  { %2856 = vmatpush1.bf16.msra.mxu0 %v3984_v9  ;;  %3020 = vmatpush1.bf16.msra.mxu1 %v3986_v10  ;;  %v4051_v9 = vcombine.high %v289_v4, %v293_v5  ;;  %v296_v10 = vld [vmem:[#allocation2 + $0x690] sm:$0xff] }
 0x160   :  { %2857 = vmatprep.subr.bf16.mxu0 %v3993_v11  ;;  %3021 = vmatprep.subr.bf16.mxu1 %v3995_v13  ;;  %v300_v11 = vld [vmem:[#allocation2 + $0x6b0] sm:$0xff]  ;;  %v297_v13 = vld [vmem:[#allocation2 + $0x698] sm:$0xff] }
 0x161   :  { %v4057_v16 = vcombine.high %v296_v10, %v300_v11  ;;  %v4056_v21 = vcombine.low %v296_v10, %v300_v11  ;;  %v4058_v23 = vcombine.low %v297_v13, %v301_v14  ;;  %v357_v10 = vld [vmem:[#allocation2 + $0x878] sm:$0xff] }
 0x163   :  { %2858 = vmatpush1.bf16.msra.mxu0 %v3992_v17  ;;  %3022 = vmatpush1.bf16.msra.mxu1 %v3994_v12  ;;  %v4059_v17 = vcombine.high %v297_v13, %v301_v14  ;;  %v304_v12 = vld [vmem:[#allocation2 + $0x6d0] sm:$0xff] }
 0x164   :  { %2859 = vmatprep.subr.bf16.mxu0 %v4001_v18  ;;  %3023 = vmatprep.subr.bf16.mxu1 %v4003_v19  ;;  %v308_v18 = vld [vmem:[#allocation2 + $0x6f0] sm:$0xff]  ;;  %v305_v19 = vld [vmem:[#allocation2 + $0x6d8] sm:$0xff] }
 0x165   :  { %v4065_v24 = vcombine.high %v304_v12, %v308_v18  ;;  %v4064_v30 = vcombine.low %v304_v12, %v308_v18  ;;  %v4066_v31 = vcombine.low %v305_v19, %v309_v20  ;;  %v365_v12 = vld [vmem:[#allocation2 + $0x8b8] sm:$0xff] }
 0x167   :  { %2860 = vmatpush1.bf16.msra.mxu0 %v4000_v26  ;;  %3024 = vmatpush1.bf16.msra.mxu1 %v4002_v27  ;;  %v4067_v26 = vcombine.high %v305_v19, %v309_v20  ;;  %v312_v27 = vld [vmem:[#allocation2 + $0x710] sm:$0xff] }
 0x168   :  { %2861 = vmatprep.subr.bf16.mxu0 %v4009_v28  ;;  %3025 = vmatprep.subr.bf16.mxu1 %v4011_v22  ;;  %v316_v28 = vld [vmem:[#allocation2 + $0x730] sm:$0xff]  ;;  %v313_v22 = vld [vmem:[#allocation2 + $0x718] sm:$0xff] }
 0x169   :  { %v4073_v33 = vcombine.high %v312_v27, %v316_v28  ;;  %v4072_v40 = vcombine.low %v312_v27, %v316_v28  ;;  %v4074_v41 = vcombine.low %v313_v22, %v317_v29  ;;  %v373_v27 = vld [vmem:[#allocation2 + $0x8f8] sm:$0xff] }
 0x16b   :  { %2862 = vmatpush1.bf16.msra.mxu0 %v4008_v35  ;;  %3026 = vmatpush1.bf16.msra.mxu1 %v4010_v36  ;;  %v4075_v35 = vcombine.high %v313_v22, %v317_v29  ;;  %v320_v36 = vld [vmem:[#allocation2 + $0x750] sm:$0xff] }
 0x16c   :  { %2863 = vmatprep.subr.bf16.mxu0 %v4017_v37  ;;  %3027 = vmatprep.subr.bf16.mxu1 %v4019_v38  ;;  %v324_v37 = vld [vmem:[#allocation2 + $0x770] sm:$0xff]  ;;  %v321_v38 = vld [vmem:[#allocation2 + $0x758] sm:$0xff] }
 0x16d   :  { %v4081_v42 = vcombine.high %v320_v36, %v324_v37  ;;  %v4080_v50 = vcombine.low %v320_v36, %v324_v37  ;;  %v4082_v51 = vcombine.low %v321_v38, %v325_v39 }
 0x16f   :  { %2864 = vmatpush1.bf16.msra.mxu0 %v4016_v44  ;;  %3028 = vmatpush1.bf16.msra.mxu1 %v4018_v45  ;;  %v4083_v44 = vcombine.high %v321_v38, %v325_v39  ;;  %v328_v45 = vld [vmem:[#allocation2 + $0x790] sm:$0xff] }
 0x170   :  { %2865 = vmatprep.subr.bf16.mxu0 %v4025_v46  ;;  %3029 = vmatprep.subr.bf16.mxu1 %v4027_v48  ;;  %v332_v46 = vld [vmem:[#allocation2 + $0x7b0] sm:$0xff]  ;;  %v329_v48 = vld [vmem:[#allocation2 + $0x798] sm:$0xff] }
 0x171   :  { %v4089_v52 = vcombine.high %v328_v45, %v332_v46  ;;  %v4088_v59 = vcombine.low %v328_v45, %v332_v46  ;;  %v4090_v60 = vcombine.low %v329_v48, %v333_v49  ;;  %v384_v39 = vld [vmem:[#allocation2 + $0x950] sm:$0xff] }
 0x173   :  { %2866 = vmatpush1.bf16.msra.mxu0 %v4024_v53  ;;  %3030 = vmatpush1.bf16.msra.mxu1 %v4026_v54  ;;  %v4091_v53 = vcombine.high %v329_v48, %v333_v49  ;;  %v336_v54 = vld [vmem:[#allocation2 + $0x7d0] sm:$0xff] }
 0x174   :  { %2867 = vmatprep.subr.bf16.mxu0 %v4033_v55  ;;  %3031 = vmatprep.subr.bf16.mxu1 %v4035_v56  ;;  %v340_v55 = vld [vmem:[#allocation2 + $0x7f0] sm:$0xff]  ;;  %v337_v56 = vld [vmem:[#allocation2 + $0x7d8] sm:$0xff] }
 0x175   :  { %v4097_v61 = vcombine.high %v336_v54, %v340_v55  ;;  %v4096_v3 = vcombine.low %v336_v54, %v340_v55  ;;  %v4098_v4 = vcombine.low %v337_v56, %v341_v58  ;;  %v392_v49 = vld [vmem:[#allocation2 + $0x990] sm:$0xff] }
 0x177   :  { %2868 = vmatpush1.bf16.msra.mxu0 %v4032_v62  ;;  %3032 = vmatpush1.bf16.msra.mxu1 %v4034_v63  ;;  %v4099_v62 = vcombine.high %v337_v56, %v341_v58  ;;  %v344_v63 = vld [vmem:[#allocation2 + $0x810] sm:$0xff] }
 0x178   :  { %2869 = vmatprep.subr.bf16.mxu0 %v4041_v0  ;;  %3033 = vmatprep.subr.bf16.mxu1 %v4043_v1  ;;  %v348_v0 = vld [vmem:[#allocation2 + $0x830] sm:$0xff]  ;;  %v345_v1 = vld [vmem:[#allocation2 + $0x818] sm:$0xff] }
 0x179   :  { %v4105_v5 = vcombine.high %v344_v63, %v348_v0  ;;  %v4104_v11 = vcombine.low %v344_v63, %v348_v0  ;;  %v4106_v13 = vcombine.low %v345_v1, %v349_v2  ;;  %v400_v58 = vld [vmem:[#allocation2 + $0x9d0] sm:$0xff] }
 0x17b   :  { %2870 = vmatpush1.bf16.msra.mxu0 %v4040_v6  ;;  %3034 = vmatpush1.bf16.msra.mxu1 %v4042_v7  ;;  %v4107_v6 = vcombine.high %v345_v1, %v349_v2  ;;  %v352_v7 = vld [vmem:[#allocation2 + $0x850] sm:$0xff] }
 0x17c   :  { %2871 = vmatprep.subr.bf16.mxu0 %v4049_v8  ;;  %3035 = vmatprep.subr.bf16.mxu1 %v4051_v9  ;;  %v356_v8 = vld [vmem:[#allocation2 + $0x870] sm:$0xff]  ;;  %v353_v9 = vld [vmem:[#allocation2 + $0x858] sm:$0xff] }
 0x17d   :  { %v4113_v14 = vcombine.high %v352_v7, %v356_v8  ;;  %v4112_v18 = vcombine.low %v352_v7, %v356_v8  ;;  %v4114_v19 = vcombine.low %v353_v9, %v357_v10  ;;  %v408_v2 = vld [vmem:[#allocation2 + $0xa10] sm:$0xff] }
 0x17f   :  { %2872 = vmatpush1.bf16.msra.mxu0 %v4048_v57  ;;  %3036 = vmatpush1.bf16.msra.mxu1 %v4050_v15  ;;  %v4115_v57 = vcombine.high %v353_v9, %v357_v10  ;;  %v360_v15 = vld [vmem:[#allocation2 + $0x890] sm:$0xff] }
 0x180   :  { %2873 = vmatprep.subr.bf16.mxu0 %v4057_v16  ;;  %3037 = vmatprep.subr.bf16.mxu1 %v4059_v17  ;;  %v364_v16 = vld [vmem:[#allocation2 + $0x8b0] sm:$0xff]  ;;  %v361_v17 = vld [vmem:[#allocation2 + $0x898] sm:$0xff] }
 0x181   :  { %v4121_v20 = vcombine.high %v360_v15, %v364_v16  ;;  %v4120_v28 = vcombine.low %v360_v15, %v364_v16  ;;  %v416_v10 = vld [vmem:[#allocation2 + $0xa50] sm:$0xff] }
 0x183   :  { %2874 = vmatpush1.bf16.msra.mxu0 %v4056_v21  ;;  %3038 = vmatpush1.bf16.msra.mxu1 %v4058_v23  ;;  %v4123_v21 = vcombine.high %v361_v17, %v365_v12  ;;  %v368_v23 = vld [vmem:[#allocation2 + $0x8d0] sm:$0xff] }
 0x184   :  { %2875 = vmatprep.subr.bf16.mxu0 %v4065_v24  ;;  %3039 = vmatprep.subr.bf16.mxu1 %v4067_v26  ;;  %v372_v24 = vld [vmem:[#allocation2 + $0x8f0] sm:$0xff]  ;;  %v369_v26 = vld [vmem:[#allocation2 + $0x8d8] sm:$0xff] }
 0x185   :  { %v4129_v22 = vcombine.high %v368_v23, %v372_v24  ;;  %v4131_v29 = vcombine.high %v369_v26, %v373_v27  ;;  %v4128_v36 = vcombine.low %v368_v23, %v372_v24  ;;  %v4130_v37 = vcombine.low %v369_v26, %v373_v27  ;;  %v432_v27 = vld [vmem:[#allocation2 + $0xad0] sm:$0xff] }
 0x187   :  { %2876 = vmatpush1.bf16.msra.mxu0 %v4064_v30  ;;  %3040 = vmatpush1.bf16.msra.mxu1 %v4066_v31  ;;  %v376_v30 = vld [vmem:[#allocation2 + $0x910] sm:$0xff] }
 0x188   :  { %2877 = vmatprep.subr.bf16.mxu0 %v4073_v33  ;;  %3041 = vmatprep.subr.bf16.mxu1 %v4075_v35  ;;  %v380_v31 = vld [vmem:[#allocation2 + $0x930] sm:$0xff]  ;;  %v377_v33 = vld [vmem:[#allocation2 + $0x918] sm:$0xff] }
 0x189   :  { %v381_v35 = vld [vmem:[#allocation2 + $0x938] sm:$0xff]  ;;  %v4137_v38 = vcombine.high %v376_v30, %v380_v31 }
 0x18a   :  { %v4138_v45 = vcombine.low %v377_v33, %v381_v35 }
 0x18b   :  { %2878 = vmatpush1.bf16.msra.mxu0 %v4072_v40  ;;  %3042 = vmatpush1.bf16.msra.mxu1 %v4074_v41  ;;  %v388_v40 = vld [vmem:[#allocation2 + $0x970] sm:$0xff]  ;;  %v385_v41 = vld [vmem:[#allocation2 + $0x958] sm:$0xff] }
 0x18c   :  { %2879 = vmatprep.subr.bf16.mxu0 %v4081_v42  ;;  %3043 = vmatprep.subr.bf16.mxu1 %v4083_v44  ;;  %v389_v42 = vld [vmem:[#allocation2 + $0x978] sm:$0xff]  ;;  %v4136_v44 = vcombine.low %v376_v30, %v380_v31  ;;  %v4145_v46 = vcombine.high %v384_v39, %v388_v40 }
 0x18d   :  { %v4147_v48 = vcombine.high %v385_v41, %v389_v42  ;;  %v4146_v54 = vcombine.low %v385_v41, %v389_v42  ;;  %v448_v42 = vld [vmem:[#allocation2 + $0xb50] sm:$0xff] }
 0x18f   :  { %2880 = vmatpush1.bf16.msra.mxu0 %v4080_v50  ;;  %3044 = vmatpush1.bf16.msra.mxu1 %v4082_v51  ;;  %v396_v50 = vld [vmem:[#allocation2 + $0x9b0] sm:$0xff]  ;;  %v393_v51 = vld [vmem:[#allocation2 + $0x998] sm:$0xff] }
 0x190   :  { %2881 = vmatprep.subr.bf16.mxu0 %v4089_v52  ;;  %3045 = vmatprep.subr.bf16.mxu1 %v4091_v53  ;;  %v397_v52 = vld [vmem:[#allocation2 + $0x9b8] sm:$0xff]  ;;  %v4144_v53 = vcombine.low %v384_v39, %v388_v40  ;;  %v4153_v55 = vcombine.high %v392_v49, %v396_v50 }
 0x191   :  { %v4155_v56 = vcombine.high %v393_v51, %v397_v52  ;;  %v4154_v63 = vcombine.low %v393_v51, %v397_v52  ;;  %v456_v52 = vld [vmem:[#allocation2 + $0xb90] sm:$0xff] }
 0x193   :  { %2882 = vmatpush1.bf16.msra.mxu0 %v4088_v59  ;;  %3046 = vmatpush1.bf16.msra.mxu1 %v4090_v60  ;;  %v404_v59 = vld [vmem:[#allocation2 + $0x9f0] sm:$0xff]  ;;  %v401_v60 = vld [vmem:[#allocation2 + $0x9d8] sm:$0xff] }
 0x194   :  { %2883 = vmatprep.subr.bf16.mxu0 %v4097_v61  ;;  %3047 = vmatprep.subr.bf16.mxu1 %v4099_v62  ;;  %v405_v61 = vld [vmem:[#allocation2 + $0x9f8] sm:$0xff]  ;;  %v4152_v62 = vcombine.low %v392_v49, %v396_v50  ;;  %v4161_v0 = vcombine.high %v400_v58, %v404_v59 }
 0x195   :  { %v4163_v1 = vcombine.high %v401_v60, %v405_v61  ;;  %v4162_v7 = vcombine.low %v401_v60, %v405_v61  ;;  %v464_v61 = vld [vmem:[#allocation2 + $0xbd0] sm:$0xff] }
 0x197   :  { %2884 = vmatpush1.bf16.msra.mxu0 %v4096_v3  ;;  %3048 = vmatpush1.bf16.msra.mxu1 %v4098_v4  ;;  %v412_v3 = vld [vmem:[#allocation2 + $0xa30] sm:$0xff]  ;;  %v409_v4 = vld [vmem:[#allocation2 + $0xa18] sm:$0xff] }
 0x198   :  { %2894 = vmatprep.subr.bf16.mxu0 %v4105_v5  ;;  %3058 = vmatprep.subr.bf16.mxu1 %v4107_v6  ;;  %v413_v5 = vld [vmem:[#allocation2 + $0xa38] sm:$0xff]  ;;  %v4160_v6 = vcombine.low %v400_v58, %v404_v59  ;;  %v4169_v8 = vcombine.high %v408_v2, %v412_v3 }
 0x199   :  { %v4171_v9 = vcombine.high %v409_v4, %v413_v5  ;;  %v4170_v15 = vcombine.low %v409_v4, %v413_v5  ;;  %v472_v5 = vld [vmem:[#allocation2 + $0xc10] sm:$0xff] }
 0x19a   :  { %2886 = vmatmul.mubr.bf16.vlgmr.msra.gmra.mrb[4].mxu0 %v4737_v25  ;;  %3050 = vmatmul.mubr.bf16.vlgmr.msra.gmra.mrb[4].mxu1 %v4737_v25  ;;  %v4122_v25 = vcombine.low %v361_v17, %v365_v12  ;;  %v424_v12 = vld [vmem:[#allocation2 + $0xa90] sm:$0xff] }
 0x19b   :  { %2895 = vmatpush1.bf16.msra.mxu0 %v4104_v11  ;;  %3059 = vmatpush1.bf16.msra.mxu1 %v4106_v13  ;;  %v420_v11 = vld [vmem:[#allocation2 + $0xa70] sm:$0xff]  ;;  %v417_v13 = vld [vmem:[#allocation2 + $0xa58] sm:$0xff] }
 0x19c   :  { %2896 = vmatprep.subr.bf16.mxu0 %v4113_v14  ;;  %3060 = vmatprep.subr.bf16.mxu1 %v4115_v57  ;;  %v421_v14 = vld [vmem:[#allocation2 + $0xa78] sm:$0xff]  ;;  %v4168_v57 = vcombine.low %v408_v2, %v412_v3  ;;  %v4177_v16 = vcombine.high %v416_v10, %v420_v11 }
 0x19d   :  { %2926 = vmatprep.mubr.bf16.mxu0 %v4739_v32  ;;  %3090 = vmatprep.mubr.bf16.mxu1 %v4739_v32  ;;  %v4139_v32 = vcombine.high %v377_v33, %v381_v35  ;;  %v4179_v17 = vcombine.high %v417_v13, %v421_v14  ;;  %v4178_v23 = vcombine.low %v417_v13, %v421_v14  ;;  %v440_v35 = vld [vmem:[#allocation2 + $0xb10] sm:$0xff] }
 0x19f   :  { %2897 = vmatpush1.bf16.msra.mxu0 %v4112_v18  ;;  %3061 = vmatpush1.bf16.msra.mxu1 %v4114_v19  ;;  %v428_v18 = vld [vmem:[#allocation2 + $0xab0] sm:$0xff]  ;;  %v425_v19 = vld [vmem:[#allocation2 + $0xa98] sm:$0xff] }
 0x1a0   :  { %2898 = vmatprep.subr.bf16.mxu0 %v4121_v20  ;;  %3062 = vmatprep.subr.bf16.mxu1 %v4123_v21  ;;  %v429_v20 = vld [vmem:[#allocation2 + $0xab8] sm:$0xff]  ;;  %v4176_v21 = vcombine.low %v416_v10, %v420_v11  ;;  %v4185_v24 = vcombine.high %v424_v12, %v428_v18 }
 0x1a1   :  { %v4187_v26 = vcombine.high %v425_v19, %v429_v20  ;;  %v4186_v30 = vcombine.low %v425_v19, %v429_v20  ;;  %v4461_v19 = vld [vmem:[#allocation6 + $0x80] sm:$0xff]   ;;  %v4462_v20 = vld [vmem:[#allocation6 + $0x48] sm:$0xff]  }
 0x1a3   :  { %2899 = vmatpush1.bf16.msra.mxu0 %v4120_v28  ;;  %3063 = vmatpush1.bf16.msra.mxu1 %v4122_v25  ;;  %v436_v28 = vld [vmem:[#allocation2 + $0xaf0] sm:$0xff]  ;;  %v433_v25 = vld [vmem:[#allocation2 + $0xad8] sm:$0xff] }
 0x1a4   :  { %2900 = vmatprep.subr.bf16.mxu0 %v4129_v22  ;;  %3064 = vmatprep.subr.bf16.mxu1 %v4131_v29  ;;  %v437_v22 = vld [vmem:[#allocation2 + $0xaf8] sm:$0xff]  ;;  %v4184_v29 = vcombine.low %v424_v12, %v428_v18  ;;  %v4193_v31 = vcombine.high %v432_v27, %v436_v28  ;;  %v4460_v12 = vld [vmem:[#allocation6] sm:$0xff]  }
 0x1a5   :  { %v4195_v33 = vcombine.high %v433_v25, %v437_v22  ;;  %v4194_v39 = vcombine.low %v433_v25, %v437_v22  ;;  %v4468_v25 = vld [vmem:[#allocation6 + $0x10] sm:$0xff]  }
 0x1a7   :  { %2901 = vmatpush1.bf16.msra.mxu0 %v4128_v36  ;;  %3065 = vmatpush1.bf16.msra.mxu1 %v4130_v37  ;;  %v444_v36 = vld [vmem:[#allocation2 + $0xb30] sm:$0xff]  ;;  %v441_v37 = vld [vmem:[#allocation2 + $0xb18] sm:$0xff] }
 0x1a8   :  { %2902 = vmatprep.subr.bf16.mxu0 %v4137_v38  ;;  %3066 = vmatprep.subr.bf16.mxu1 %v4139_v32  ;;  %v445_v38 = vld [vmem:[#allocation2 + $0xb38] sm:$0xff]  ;;  %v4192_v32 = vcombine.low %v432_v27, %v436_v28  ;;  %v4201_v40 = vcombine.high %v440_v35, %v444_v36 }
 0x1a9   :  { %v4203_v41 = vcombine.high %v441_v37, %v445_v38  ;;  %v4202_v49 = vcombine.low %v441_v37, %v445_v38  ;;  %v4467_v28 = vld [vmem:[#allocation6 + $0xd0] sm:$0xff]  }
 0x1ab   :  { %2903 = vmatpush1.bf16.msra.mxu0 %v4136_v44  ;;  %3067 = vmatpush1.bf16.msra.mxu1 %v4138_v45  ;;  %v452_v44 = vld [vmem:[#allocation2 + $0xb70] sm:$0xff]  ;;  %v449_v45 = vld [vmem:[#allocation2 + $0xb58] sm:$0xff] }
 0x1ac   :  { %2904 = vmatprep.subr.bf16.mxu0 %v4145_v46  ;;  %3068 = vmatprep.subr.bf16.mxu1 %v4147_v48  ;;  %v453_v46 = vld [vmem:[#allocation2 + $0xb78] sm:$0xff]  ;;  %v4200_v48 = vcombine.low %v440_v35, %v444_v36  ;;  %v4209_v50 = vcombine.high %v448_v42, %v452_v44 }
 0x1ad   :  { %v4211_v51 = vcombine.high %v449_v45, %v453_v46  ;;  %v4210_v58 = vcombine.low %v449_v45, %v453_v46  ;;  %v4474_v45 = vld [vmem:[#allocation6 + $0x60] sm:$0xff]  }
 0x1af   :  { %2905 = vmatpush1.bf16.msra.mxu0 %v4144_v53  ;;  %3069 = vmatpush1.bf16.msra.mxu1 %v4146_v54  ;;  %v460_v53 = vld [vmem:[#allocation2 + $0xbb0] sm:$0xff]  ;;  %v457_v54 = vld [vmem:[#allocation2 + $0xb98] sm:$0xff] }
 0x1b0   :  { %2906 = vmatprep.subr.bf16.mxu0 %v4153_v55  ;;  %3070 = vmatprep.subr.bf16.mxu1 %v4155_v56  ;;  %v461_v55 = vld [vmem:[#allocation2 + $0xbb8] sm:$0xff]  ;;  %v4208_v56 = vcombine.low %v448_v42, %v452_v44  ;;  %v4217_v59 = vcombine.high %v456_v52, %v460_v53  ;;  %v4473_v44 = vld [vmem:[#allocation6 + $0x98] sm:$0xff]  }
 0x1b1   :  { %v4219_v60 = vcombine.high %v457_v54, %v461_v55  ;;  %v4218_v2 = vcombine.low %v457_v54, %v461_v55  ;;  %v4477_v55 = vld [vmem:[#allocation6 + $0xa0] sm:$0xff]  }
 0x1b3   :  { %2907 = vmatpush1.bf16.msra.mxu0 %v4152_v62  ;;  %3071 = vmatpush1.bf16.msra.mxu1 %v4154_v63  ;;  %v468_v62 = vld [vmem:[#allocation2 + $0xbf0] sm:$0xff]  ;;  %v465_v63 = vld [vmem:[#allocation2 + $0xbd8] sm:$0xff] }
 0x1b4   :  { %2908 = vmatprep.subr.bf16.mxu0 %v4161_v0  ;;  %3072 = vmatprep.subr.bf16.mxu1 %v4163_v1  ;;  %v469_v0 = vld [vmem:[#allocation2 + $0xbf8] sm:$0xff]  ;;  %v4216_v1 = vcombine.low %v456_v52, %v460_v53  ;;  %v4225_v3 = vcombine.high %v464_v61, %v468_v62  ;;  %v4476_v52 = vld [vmem:[#allocation6 + $0x20] sm:$0xff]  }
 0x1b5   :  { %v4227_v4 = vcombine.high %v465_v63, %v469_v0  ;;  %v4226_v10 = vcombine.low %v465_v63, %v469_v0  ;;  %v4482_v63 = vld [vmem:[#allocation6 + $0x70] sm:$0xff]  }
 0x1b7   :  { %2909 = vmatpush1.bf16.msra.mxu0 %v4160_v6  ;;  %3073 = vmatpush1.bf16.msra.mxu1 %v4162_v7  ;;  %v476_v6 = vld [vmem:[#allocation2 + $0xc30] sm:$0xff]  ;;  %v473_v7 = vld [vmem:[#allocation2 + $0xc18] sm:$0xff] }
 0x1b8   :  { %2910 = vmatprep.subr.bf16.mxu0 %v4169_v8  ;;  %3074 = vmatprep.subr.bf16.mxu1 %v4171_v9  ;;  %v477_v8 = vld [vmem:[#allocation2 + $0xc38] sm:$0xff]  ;;  %v4224_v9 = vcombine.low %v464_v61, %v468_v62  ;;  %v4233_v11 = vcombine.high %v472_v5, %v476_v6  ;;  %v4232_v14 = vcombine.low %v472_v5, %v476_v6  ;;  %v4481_v62 = vld [vmem:[#allocation6 + $0xa8] sm:$0xff]   ;;  %v4486_v5 = vld [vmem:[#allocation6 + $0x78] sm:$0xff]  }
 0x1b9   :  { %v4235_v13 = vcombine.high %v473_v7, %v477_v8 }
 0x1bb   :  { %2911 = vmatpush1.bf16.msra.mxu0 %v4168_v57  ;;  %3075 = vmatpush1.bf16.msra.mxu1 %v4170_v15  ;;  %v4234_v57 = vcombine.low %v473_v7, %v477_v8  ;;  %v4458_v15 = vld [vmem:[#allocation6 + $0x40] sm:$0xff]   ;;  %v4487_v7 = vld [vmem:[#allocation6 + $0xf8] sm:$0xff]  }
 0x1bc   :  { %2912 = vmatprep.subr.bf16.mxu0 %v4177_v16  ;;  %3076 = vmatprep.subr.bf16.mxu1 %v4179_v17  ;;  %v4459_v16 = vld [vmem:[#allocation6 + $0xc0] sm:$0xff]   ;;  %v480_v17 = vlaneseq  ;;  %v4488_v8 = vld [vmem:[#allocation6 + $0x38] sm:$0xff]  }
 0x1be   :  { %v4777_v18 = vshrl.u32 %v480_v17, 7  ;;  %v4494_v17 = vld [vmem:[#allocation6 + $0x148] sm:$0xff]  }
 0x1bf   :  { %2913 = vmatpush1.bf16.msra.mxu0 %v4176_v21  ;;  %3077 = vmatpush1.bf16.msra.mxu1 %v4178_v23  ;;  %v4463_v21 = vld [vmem:[#allocation6 + $0xc8] sm:$0xff]  }
 0x1c0   :  { %2914 = vmatprep.subr.bf16.mxu0 %v4185_v24  ;;  %3078 = vmatprep.subr.bf16.mxu1 %v4187_v26  ;;  %v486_v23 = vsub.s32 1, %v4777_v18  ;;  %v4466_v24 = vld [vmem:[#allocation6 + $0x50] sm:$0xff]   ;;  %v4784_v26 = vld [vmem:[#allocation4] sm:$0xff]  ;;  %v494_v27 = vsub.s32 3, %v4777_v18  ;;  %v482_v53 = vsub.s32 0, %v4777_v18 }
 0x1c2   :  { %v487_v22 = vrot.slane %v4784_v26, %v486_v23  ;;  %v483_v61 = vrot.slane %v4784_v26, %v482_v53  ;;  %v4499_v23 = vld [vmem:[#allocation6 + $0x1d0] sm:$0xff]  }
 0x1c3   :  { %2915 = vmatpush1.bf16.msra.mxu0 %v4184_v29  ;;  %3079 = vmatpush1.bf16.msra.mxu1 %v4186_v30  ;;  %v495_v29 = vrot.slane %v4784_v26, %v494_v27  ;;  %v4470_v30 = vld [vmem:[#allocation6 + $0x58] sm:$0xff]  }
 0x1c4   :  { %2916 = vmatprep.subr.bf16.mxu0 %v4193_v31  ;;  %3080 = vmatprep.subr.bf16.mxu1 %v4195_v33  ;;  %v4471_v33 = vld [vmem:[#allocation6 + $0xd8] sm:$0xff]  }
 0x1c5   :  { %v4502_v27 = vld [vmem:[#allocation6 + $0x158] sm:$0xff]  }
 0x1c7   :  { %2917 = vmatpush1.bf16.msra.mxu0 %v4192_v32  ;;  %3081 = vmatpush1.bf16.msra.mxu1 %v4194_v39  ;;  %v4472_v39 = vld [vmem:[#allocation6 + $0x18] sm:$0xff]  }
 0x1c8   :  { %2918 = vmatprep.subr.bf16.mxu0 %v4201_v40  ;;  %3082 = vmatprep.subr.bf16.mxu1 %v4203_v41 }
 0x1cb   :  { %2919 = vmatpush1.bf16.msra.mxu0 %v4200_v48  ;;  %3083 = vmatpush1.bf16.msra.mxu1 %v4202_v49  ;;  %v4475_v49 = vld [vmem:[#allocation6 + $0xe0] sm:$0xff]  }
 0x1cc   :  { %2920 = vmatprep.subr.bf16.mxu0 %v4209_v50  ;;  %3084 = vmatprep.subr.bf16.mxu1 %v4211_v51 }
 0x1cf   :  { %2921 = vmatpush1.bf16.msra.mxu0 %v4208_v56  ;;  %3085 = vmatpush1.bf16.msra.mxu1 %v4210_v58  ;;  %v4478_v56 = vld [vmem:[#allocation6 + $0x68] sm:$0xff]   ;;  %v490_v58 = vsub.s32 2, %v4777_v18 }
 0x1d0   :  { %2922 = vmatprep.subr.bf16.mxu0 %v4217_v59  ;;  %3086 = vmatprep.subr.bf16.mxu1 %v4219_v60  ;;  %v4479_v59 = vld [vmem:[#allocation6 + $0xe8] sm:$0xff]  }
 0x1d1   :  { %v4480_v60 = vld [vmem:[#allocation6 + $0x28] sm:$0xff]   ;;  %v491_v0 = vrot.slane %v4784_v26, %v490_v58 }
 0x1d3   :  { %2923 = vmatpush1.bf16.msra.mxu0 %v4216_v1  ;;  %3087 = vmatpush1.bf16.msra.mxu1 %v4218_v2  ;;  %v4483_v1 = vld [vmem:[#allocation6 + $0xf0] sm:$0xff]  }
 0x1d4   :  { %2924 = vmatprep.subr.bf16.mxu0 %v4225_v3  ;;  %3088 = vmatprep.subr.bf16.mxu1 %v4227_v4  ;;  %v4484_v2 = vld [vmem:[#allocation6 + $0x30] sm:$0xff]  }
 0x1d5   :  { %v4485_v4 = vld [vmem:[#allocation6 + $0xb0] sm:$0xff]  }
 0x1d7   :  { %2925 = vmatpush1.bf16.msra.mxu0 %v4224_v9  ;;  %3089 = vmatpush1.bf16.msra.mxu1 %v4226_v10  ;;  %v4489_v10 = vld [vmem:[#allocation6 + $0xb8] sm:$0xff]  }
 0x1d8   :  { %2935 = vmatprep.subr.bf16.mxu0 %v4233_v11  ;;  %3099 = vmatprep.subr.bf16.mxu1 %v4235_v13  ;;  %v4490_v11 = vld [vmem:[#allocation6 + $0x140] sm:$0xff]  }
 0x1da   :  { %2927 = vmatmul.mubr.bf16.vlgmr.msra.gmra.mrb[4].mxu0 %v4748_v34  ;;  %3091 = vmatmul.mubr.bf16.vlgmr.msra.gmra.mrb[4].mxu1 %v4748_v34  ;;  %v4464_v34 = vld [vmem:[#allocation6 + $0x8] sm:$0xff]  }
 0x1db   :  { %2936 = vmatpush1.bf16.msra.mxu0 %v4232_v14  ;;  %3100 = vmatpush1.bf16.msra.mxu1 %v4234_v57  ;;  %v4491_v14 = vld [vmem:[#allocation6 + $0x1c0] sm:$0xff]  }
 0x1dc   :  { %2967 = vmatprep.mubr.bf16.mxu0 %v4624_v43  ;;  %3131 = vmatprep.mubr.bf16.mxu1 %v4624_v43  ;;  %v4465_v43 = vld [vmem:[#allocation6 + $0x88] sm:$0xff]   ;;  %v4492_v57 = vld [vmem:[#allocation6 + $0x100] sm:$0xff]  }
 0x1dd   :  { %4305 = vmatprep.subr.bf16.mxu0 %v4458_v15  ;;  %4327 = vmatprep.subr.bf16.mxu1 %v4459_v16  ;;  %v4493_v16 = vld [vmem:[#allocation6 + $0x180] sm:$0xff]  }
 0x1e6   :  { %4238 = vmatmul.mubr.msk.bf16.vlgmr.msra.gmra.mrb[4].mxu0 %vm2480_vm0, %v4757_v47  ;;  %4239 = vmatmul.mubr.msk.bf16.vlgmr.msra.gmra.mrb[4].mxu1 %vm2480_vm0, %v4757_v47  ;;  %v4469_v47 = vld [vmem:[#allocation6 + $0x90] sm:$0xff]  }
 0x1e7   :  { %4306 = vmatpush3.bf16.msra.mxu0 %v4460_v12  ;;  %4328 = vmatpush3.bf16.msra.mxu1 %v4461_v19  ;;  %v4495_v19 = vld [vmem:[#allocation6 + $0x1c8] sm:$0xff]  }
 0x1e8   :  { %4307 = vmatprep.subr.bf16.mxu0 %v4462_v20  ;;  %4329 = vmatprep.subr.bf16.mxu1 %v4463_v21  ;;  %v4496_v20 = vld [vmem:[#allocation6 + $0x108] sm:$0xff]  }
 0x1e9   :  { %v4497_v21 = vld [vmem:[#allocation6 + $0x188] sm:$0xff]  }
 0x1eb   :  { %4308 = vmatpush3.bf16.msra.mxu0 %v4464_v34  ;;  %4330 = vmatpush3.bf16.msra.mxu1 %v4465_v43  ;;  %v4498_v34 = vld [vmem:[#allocation6 + $0x150] sm:$0xff]  }
 0x1ec   :  { %4309 = vmatprep.subr.bf16.mxu0 %v4466_v24  ;;  %4331 = vmatprep.subr.bf16.mxu1 %v4467_v28  ;;  %v4500_v43 = vld [vmem:[#allocation6 + $0x110] sm:$0xff]   ;;  %v4503_v28 = vld [vmem:[#allocation6 + $0x1d8] sm:$0xff]  }
 0x1ed   :  { %v2641_v31 = vpop.f32.mrb[0].mxu0  ;;  %v2805_v35 = vpop.f32.mrb[0].mxu1  ;;  %v4501_v24 = vld [vmem:[#allocation6 + $0x190] sm:$0xff]  }
 0x1ee   :  { %v2643_v36 = vpop.f32.mrb[1].mxu0  ;;  %v2807_v38 = vpop.f32.mrb[1].mxu1  ;;  %v4393_v3 = vadd.f32 %v2641_v31, %v483_v61  ;;  %v4395_v6 = vadd.f32 %v2805_v35, %v491_v0  ;;  %v4509_v31 = vld [vmem:[#allocation6 + $0x1a0] sm:$0xff]   ;;  %v4511_v35 = vld [vmem:[#allocation6 + $0x1e8] sm:$0xff]  }
 0x1ef   :  { %4310 = vmatpush3.bf16.msra.mxu0 %v4468_v25  ;;  %v4394_v37 = vadd.f32 %v2643_v36, %v487_v22  ;;  %v2645_v32 = vpop.f32.mrb[2].mxu0  ;;  %4332 = vmatpush3.bf16.msra.mxu1 %v4469_v47  ;;  %v4396_v40 = vadd.f32 %v2807_v38, %v495_v29  ;;  %v2809_v41 = vpop.f32.mrb[2].mxu1  ;;  %v4504_v25 = vld [vmem:[#allocation6 + $0x118] sm:$0xff]   ;;  %v4506_v47 = vld [vmem:[#allocation6 + $0x160] sm:$0xff]   ;;  %v4512_v36 = vld [vmem:[#allocation6 + $0x128] sm:$0xff]  }
 0x1f0   :  { %v2646_v42 = vpop.f32.mrb[3].mxu0  ;;  %4311 = vmatprep.subr.bf16.mxu0 %v4470_v30  ;;  %v2810_v48 = vpop.f32.mrb[3].mxu1  ;;  %4333 = vmatprep.subr.bf16.mxu1 %v4471_v33  ;;  %v3140_v9 = vmax.f32 %v4393_v3, 0.0  ;;  %v3142_v13 = vmax.f32 %v4395_v6, 0.0  ;;  %v4505_v22 = vld [vmem:[#allocation6 + $0x198] sm:$0xff]   ;;  %v4507_v29 = vld [vmem:[#allocation6 + $0x1e0] sm:$0xff]  }
 0x1f1   :  { %v3141_v46 = vmax.f32 %v4394_v37, 0.0  ;;  %v3143_v50 = vmax.f32 %v4396_v40, 0.0  ;;  %v4508_v30 = vld [vmem:[#allocation6 + $0x120] sm:$0xff]   ;;  %v4510_v33 = vld [vmem:[#allocation6 + $0x168] sm:$0xff]   ;;  %v4514_v38 = vld [vmem:[#allocation6 + $0x170] sm:$0xff]   ;;  %v506_v48 = vsub.s32 6, %v4777_v18 }
 0x1f2   :  { %v3148_v15 = vpack.c.bf16 %v3140_v9, %v3140_v9  ;;  %v3150_v12 = vpack.c.bf16 %v3142_v13, %v3142_v13  ;;  %v4513_v37 = vld [vmem:[#allocation6 + $0x1a8] sm:$0xff]   ;;  %v4515_v32 = vld [vmem:[#allocation6 + $0x1f0] sm:$0xff]   ;;  %v4518_v41 = vld [vmem:[#allocation6 + $0x178] sm:$0xff]  }
 0x1f3   :  { %v3149_v51 = vpack.c.bf16 %v3141_v46, %v3141_v46  ;;  %4312 = vmatpush3.bf16.msra.mxu0 %v4472_v39  ;;  %v3151_v54 = vpack.c.bf16 %v3143_v50, %v3143_v50  ;;  %4334 = vmatpush3.bf16.msra.mxu1 %v4473_v44  ;;  %v4516_v39 = vld [vmem:[#allocation6 + $0x130] sm:$0xff]   ;;  %v4519_v42 = vld [vmem:[#allocation6 + $0x1f8] sm:$0xff]   ;;  %v498_v46 = vsub.s32 4, %v4777_v18  ;;  %v510_v50 = vsub.s32 7, %v4777_v18  ;;  %v4240_v13 = vld [vmem:[#allocation7] ss:$0 sm:$0xff] }
 0x1f4   :  { %4313 = vmatprep.subr.bf16.mxu0 %v4474_v45  ;;  %4335 = vmatprep.subr.bf16.mxu1 %v4475_v49  ;;  %v4517_v40 = vld [vmem:[#allocation6 + $0x1b0] sm:$0xff]   ;;  %v4520_v44 = vld [vmem:[#allocation6 + $0x138] sm:$0xff]   ;;  %v502_v49 = vsub.s32 5, %v4777_v18 }
 0x1f5   :  { %3707 = vmatprep.mubr.bf16.mxu0 %v3149_v51  ;;  %3747 = vmatprep.mubr.bf16.mxu1 %v3151_v54  ;;  %v4521_v45 = vld [vmem:[#allocation6 + $0x1b8] sm:$0xff]   ;;  %v499_v51 = vrot.slane %v4784_v26, %v498_v46  ;;  %v511_v54 = vrot.slane %v4784_v26, %v510_v50 }
 0x1f6   :  { %v503_v53 = vrot.slane %v4784_v26, %v502_v49 }
 0x1f7   :  { %4314 = vmatpush3.bf16.msra.mxu0 %v4476_v52  ;;  %4336 = vmatpush3.bf16.msra.mxu1 %v4477_v55  ;;  %v507_v52 = vrot.slane %v4784_v26, %v506_v48 }
 0x1f8   :  { %4315 = vmatprep.subr.bf16.mxu0 %v4478_v56  ;;  %4337 = vmatprep.subr.bf16.mxu1 %v4479_v59 }
 0x1fb   :  { %4316 = vmatpush3.bf16.msra.mxu0 %v4480_v60  ;;  %4338 = vmatpush3.bf16.msra.mxu1 %v4481_v62 }
 0x1fc   :  { %4317 = vmatprep.subr.bf16.mxu0 %v4482_v63  ;;  %4339 = vmatprep.subr.bf16.mxu1 %v4483_v1 }
 0x1ff   :  { %4318 = vmatpush3.bf16.msra.mxu0 %v4484_v2  ;;  %4340 = vmatpush3.bf16.msra.mxu1 %v4485_v4 }
 0x200   :  { %4319 = vmatprep.subr.bf16.mxu0 %v4486_v5  ;;  %4341 = vmatprep.subr.bf16.mxu1 %v4487_v7 }
 0x203   :  { %4320 = vmatpush3.bf16.msra.mxu0 %v4488_v8  ;;  %4342 = vmatpush3.bf16.msra.mxu1 %v4489_v10 }
 0x204   :  { %4349 = vmatprep.subr.bf16.mxu0 %v4490_v11  ;;  %4371 = vmatprep.subr.bf16.mxu1 %v4491_v14 }
 0x206   :  { %3708 = vmatmul.mubr.bf16.vlgmr.msra.gmra.mrb[8].mxu0 %v3148_v15  ;;  %3748 = vmatmul.mubr.bf16.vlgmr.msra.gmra.mrb[8].mxu1 %v3150_v12 }
 0x207   :  { %4350 = vmatpush3.bf16.msra.mxu0 %v4492_v57  ;;  %4372 = vmatpush3.bf16.msra.mxu1 %v4493_v16 }
 0x208   :  { %4351 = vmatprep.subr.bf16.mxu0 %v4494_v17  ;;  %4373 = vmatprep.subr.bf16.mxu1 %v4495_v19 }
 0x20b   :  { %4352 = vmatpush3.bf16.msra.mxu0 %v4496_v20  ;;  %4374 = vmatpush3.bf16.msra.mxu1 %v4497_v21 }
 0x20c   :  { %4353 = vmatprep.subr.bf16.mxu0 %v4498_v34  ;;  %4375 = vmatprep.subr.bf16.mxu1 %v4499_v23 }
 0x20f   :  { %4354 = vmatpush3.bf16.msra.mxu0 %v4500_v43  ;;  %4376 = vmatpush3.bf16.msra.mxu1 %v4501_v24 }
 0x210   :  { %4355 = vmatprep.subr.bf16.mxu0 %v4502_v27  ;;  %4377 = vmatprep.subr.bf16.mxu1 %v4503_v28 }
 0x213   :  { %4356 = vmatpush3.bf16.msra.mxu0 %v4504_v25  ;;  %4378 = vmatpush3.bf16.msra.mxu1 %v4505_v22 }
 0x214   :  { %4357 = vmatprep.subr.bf16.mxu0 %v4506_v47  ;;  %4379 = vmatprep.subr.bf16.mxu1 %v4507_v29 }
 0x217   :  { %4358 = vmatpush3.bf16.msra.mxu0 %v4508_v30  ;;  %4380 = vmatpush3.bf16.msra.mxu1 %v4509_v31 }
 0x218   :  { %4359 = vmatprep.subr.bf16.mxu0 %v4510_v33  ;;  %4381 = vmatprep.subr.bf16.mxu1 %v4511_v35 }
 0x21b   :  { %4360 = vmatpush3.bf16.msra.mxu0 %v4512_v36  ;;  %4382 = vmatpush3.bf16.msra.mxu1 %v4513_v37 }
 0x21c   :  { %4361 = vmatprep.subr.bf16.mxu0 %v4514_v38  ;;  %4383 = vmatprep.subr.bf16.mxu1 %v4515_v32 }
 0x21f   :  { %4362 = vmatpush3.bf16.msra.mxu0 %v4516_v39  ;;  %4384 = vmatpush3.bf16.msra.mxu1 %v4517_v40 }
 0x220   :  { %4363 = vmatprep.subr.bf16.mxu0 %v4518_v41  ;;  %4385 = vmatprep.subr.bf16.mxu1 %v4519_v42 }
 0x223   :  { %4364 = vmatpush3.bf16.msra.mxu0 %v4520_v44  ;;  %4386 = vmatpush3.bf16.msra.mxu1 %v4521_v45 }
 0x2b9   :  { %v2969_v55 = vpop.f32.mrb[4].mxu0  ;;  %v3133_v58 = vpop.f32.mrb[4].mxu1 }
 0x2ba   :  { %v4397_v56 = vadd.f32 %v2969_v55, %v499_v51  ;;  %v2971_v59 = vpop.f32.mrb[5].mxu0  ;;  %v4399_v60 = vadd.f32 %v3133_v58, %v507_v52  ;;  %v3135_v62 = vpop.f32.mrb[5].mxu1 }
 0x2bb   :  { %v4398_v61 = vadd.f32 %v2971_v59, %v503_v53  ;;  %v2973_v63 = vpop.f32.mrb[6].mxu0  ;;  %v4400_v1 = vadd.f32 %v3135_v62, %v511_v54  ;;  %v3137_v2 = vpop.f32.mrb[6].mxu1 }
 0x2bc   :  { %v3144_v0 = vmax.f32 %v4397_v56, 0.0  ;;  %v2974_v18 = vpop.f32.mrb[7].mxu0  ;;  %v3146_v3 = vmax.f32 %v4399_v60, 0.0  ;;  %v3138_v5 = vpop.f32.mrb[7].mxu1 }
 0x2bd   :  { %v3145_v4 = vmax.f32 %v4398_v61, 0.0  ;;  %v3147_v6 = vmax.f32 %v4400_v1, 0.0 }
 0x2be   :  { %v3152_v8 = vpack.c.bf16 %v3144_v0, %v3144_v0  ;;  %v3154_v26 = vpack.c.bf16 %v3146_v3, %v3146_v3 }
 0x2bf   :  { %v3153_v7 = vpack.c.bf16 %v3145_v4, %v3145_v4  ;;  %v3155_v9 = vpack.c.bf16 %v3147_v6, %v3147_v6 }
 0x2c1   :  { %3787 = vmatprep.mubr.bf16.mxu0 %v3153_v7  ;;  %3827 = vmatprep.mubr.bf16.mxu1 %v3155_v9 }
 0x2c2   :  { %3788 = vmatmul.mubr.bf16.vlgmr.msra.gmra.mrb[12].mxu0 %v3152_v8  ;;  %3828 = vmatmul.mubr.bf16.vlgmr.msra.gmra.mrb[12].mxu1 %v3154_v26 }
 0x2d9   :  { %v4321_v10 = vpop.f32.mrb[8].mxu0  ;;  %v4343_v11 = vpop.f32.mrb[8].mxu1 }
 0x2da   :  { %v4322_v14 = vpop.f32.mrb[9].mxu0  ;;  %v4344_v15 = vpop.f32.mrb[9].mxu1 }
 0x2db   :  { %v4323_v57 = vadd.f32 %v4322_v14, %v4321_v10  ;;  %v4324_v16 = vpop.f32.mrb[10].mxu0  ;;  %v4345_v17 = vadd.f32 %v4344_v15, %v4343_v11  ;;  %v4346_v12 = vpop.f32.mrb[10].mxu1 }
 0x2dc   :  { %v4325_v19 = vpop.f32.mrb[11].mxu0  ;;  %v4347_v21 = vpop.f32.mrb[11].mxu1 }
 0x2dd   :  { %v3710_v20 = vadd.f32 %v4323_v57, %v4240_v13 }
 0x2df   :  { %v3750_v34 = vadd.f32 %v4345_v17, %v3710_v20 }
 0x395   :  { %v4365_v23 = vpop.f32.mrb[12].mxu0  ;;  %v4387_v43 = vpop.f32.mrb[12].mxu1 }
 0x396   :  { %v4366_v24 = vpop.f32.mrb[13].mxu0  ;;  %v4388_v28 = vpop.f32.mrb[13].mxu1 }
 0x397   :  { %v4367_v27 = vadd.f32 %v4366_v24, %v4365_v23  ;;  %v4368_v25 = vpop.f32.mrb[14].mxu0  ;;  %v4389_v22 = vadd.f32 %v4388_v28, %v4387_v43  ;;  %v4390_v47 = vpop.f32.mrb[14].mxu1 }
 0x398   :  { %v4369_v29 = vpop.f32.mrb[15].mxu0  ;;  %v4391_v31 = vpop.f32.mrb[15].mxu1 }
 0x399   :  { %v3790_v30 = vadd.f32 %v4367_v27, %v3750_v34 }
 0x39b   :  { %v3830_v33 = vadd.f32 %v4389_v22, %v3790_v30 }
 0x39d   :  { %v3835_v35 = vpack.c.bf16 %v3830_v33, %v3830_v33 }
 0x39f   :  { %3836 = vst [vmem:[%s4809_s5] sm:$0xf] %v3835_v35 }
 0x3a0   :  { %3841 = vsyncpa [#allocation3], 1 }
 0x3a1   :  { %3842 = vsyncpa [#allocation5], 1 }
 0x3a2   :  { %3843 = vsyncpa [#allocation8], 1 }

</bundles_post_ra>
